<compile_context>
chip_gen: v5e
topology: v5e:2x2
jax: 0.10.0
libtpu: 0.0.40
codegen_flags: <defaults>
</compile_context>

<pallas_src>
import functools
import math

import jax
import jax.numpy as jnp
from jax import lax
from jax.experimental import pallas as pl
from jax.experimental.pallas import tpu as pltpu

# On v6e / v7x set this to jnp.bfloat16 to halve weight-DMA bytes and run the MXU at its
# full bf16 rate (accumulation stays f32 via preferred_element_type).  Kept f32 here so
# numerics match the PyTorch reference bit-for-bit and so v5e (no bf16 VPU/EUP) is safe.
WEIGHT_DTYPE = jnp.float32


# ------------------------------- fused kernel -------------------------------

def _decoder_block_kernel(
        # per-batch data
        x_ref, key_ref, val_ref, srcpad_ref,
        # masked self-attention (DecoderBlock.attention) + decoder LayerNorm
        wqkv_s_ref, bqkv_s_ref, wo_s_ref, bo_s_ref, ln_g_ref, ln_b_ref,
        # cross-attention (TransformerBlock.attention) + norm1
        wq_c_ref, bq_c_ref, wk_c_ref, bk_c_ref, wv_c_ref, bv_c_ref,
        wo_c_ref, bo_c_ref, ln1_g_ref, ln1_b_ref,
        # feed-forward + norm2
        w1_ref, b1_ref, w2_ref, b2_ref, ln2_g_ref, ln2_b_ref,
        # output + scratch
        out_ref, ctx_ref,
        *, num_heads, head_dim):
    E = num_heads * head_dim
    neg_fill = jnp.float32(-1e-30)   # faithful to the reference masked_fill(mask==0, -1e-30)

    def mm(x, w_ref, b_ref):
        w = w_ref[...]
        return jnp.dot(x.astype(w.dtype), w,
                       preferred_element_type=jnp.float32) + b_ref[...]

    def layernorm(y, g_ref, b_ref):
        # single-pass statistics: one sum + one sum-of-squares (halves XLU reductions)
        inv_n = 1.0 / y.shape[-1]
        mean = jnp.sum(y, axis=-1, keepdims=True) * inv_n
        meansq = jnp.sum(y * y, axis=-1, keepdims=True) * inv_n
        var = meansq - mean * mean              # biased variance (PyTorch LayerNorm)
        return (y - mean) * lax.rsqrt(var + 1e-5) * g_ref[...] + b_ref[...]

    def attention(q, k, v, keep_mask):
        # q: [Lq, E], k/v: [Lk, E]; keep_mask broadcastable to [Lq, Lk] (True = keep).
        # Heads live in lane slices; each head's [Lq, D] output is stored directly into
        # the ctx scratch slice (no concatenate, no cross-lane shuffles).
        for h in range(num_heads):              # static unroll over heads
            lo = h * head_dim
            qh = q[:, lo:lo + head_dim]
            kh = k[:, lo:lo + head_dim]
            vh = v[:, lo:lo + head_dim]
            # q @ k^T contracting the last dims of both operands (no transpose).
            s = lax.dot_general(qh, kh, (((1,), (1,)), ((), ())),
                                preferred_element_type=jnp.float32)
            s = jnp.where(keep_mask, s, neg_fill)
            s_max = jnp.max(s, axis=-1, keepdims=True)
            e = jnp.exp(s - s_max)
            p = e / jnp.sum(e, axis=-1, keepdims=True)   # exact div for f32 parity
            ctx_ref[:, lo:lo + head_dim] = jnp.dot(
                p.astype(vh.dtype), vh, preferred_element_type=jnp.float32)
        return ctx_ref[...]

    x = x_ref[0]        # [Lq, E]
    k_in = key_ref[0]   # [Lk, E]  encoder output (key)
    v_in = val_ref[0]   # [Lk, E]  encoder output (value)
    Lq = x.shape[0]

    # ---- masked self-attention: one fused [E, 3E] QKV matmul (scale folded into Wq) ----
    qkv = mm(x, wqkv_s_ref, bqkv_s_ref)          # [Lq, 3E]
    q_s = qkv[:, :E]
    k_s = qkv[:, E:2 * E]
    v_s = qkv[:, 2 * E:]
    row = lax.broadcasted_iota(jnp.int32, (Lq, Lq), 0)
    col = lax.broadcasted_iota(jnp.int32, (Lq, Lq), 1)
    ctx = attention(q_s, k_s, v_s, row >= col)   # causal target mask generated in-kernel
    attn = mm(ctx, wo_s_ref, bo_s_ref)
    # DecoderBlock: x = dropout(norm(attention) + x); dropout is identity (eval mode)
    x_new = layernorm(attn, ln_g_ref, ln_b_ref) + x

    # ---- cross-attention (query = x_new, key/value = encoder output) ----
    q_c = mm(x_new, wq_c_ref, bq_c_ref)          # scale folded into Wq_c
    k_c = mm(k_in, wk_c_ref, bk_c_ref)
    v_c = mm(v_in, wv_c_ref, bv_c_ref)
    pad_keep = srcpad_ref[0] != 0                # [1, Lk] int compare, broadcast over Lq
    ctx2 = attention(q_c, k_c, v_c, pad_keep)
    attn2 = mm(ctx2, wo_c_ref, bo_c_ref)
    # TransformerBlock: skip1 = dropout(norm1(attention + query))
    skip1 = layernorm(attn2 + x_new, ln1_g_ref, ln1_b_ref)

    # ---- feed-forward (W1 -> ReLU -> W2); the 4E-wide hidden never leaves VMEM/vregs ----
    h = jnp.maximum(mm(skip1, w1_ref, b1_ref), 0.0)
    y = mm(h, w2_ref, b2_ref)
    # skip2 = dropout(norm2(forward + skip1))
    out_ref[0] = layernorm(y + skip1, ln2_g_ref, ln2_b_ref)


# ----------------------------- pallas_call wrapper -----------------------------

def decoder_block_forward(params, x, value, key, source_mask, target_mask,
                          embed_size, num_heads):
    """Fused DecoderBlock forward: x/value/key are [N, L, E]."""
    N, Lq, E = x.shape
    Lk = key.shape[1]
    assert value.shape == key.shape, "key and value length must match"
    head_dim = E // num_heads

    # TODO(synk): the fused kernel generates the standard causal target mask in-kernel
    # (broadcasted_iota) and treats source_mask as a key-padding mask broadcastable to
    # [N, 1, 1, Lk]; arbitrary dense target masks are not supported in this fused path.
    del target_mask
    src_pad = (source_mask.reshape(N, Lk) != 0).astype(jnp.int32).reshape(N, 1, Lk)

    weight_args = [
        params["wqkv_s"], params["bqkv_s"], params["wo_s"], params["bo_s"],
        params["ln_g"], params["ln_b"],
        params["wq_c"], params["bq_c"], params["wk_c"], params["bk_c"],
        params["wv_c"], params["bv_c"], params["wo_c"], params["bo_c"],
        params["ln1_g"], params["ln1_b"],
        params["w1"], params["b1"], params["w2"], params["b2"],
        params["ln2_g"], params["ln2_b"],
    ]
    weight_specs = [pl.BlockSpec(w.shape, lambda n: (0, 0)) for w in weight_args]

    kernel = functools.partial(_decoder_block_kernel,
                               num_heads=num_heads, head_dim=head_dim)
    return pl.pallas_call(
        kernel,
        out_shape=jax.ShapeDtypeStruct((N, Lq, E), jnp.float32),
        grid=(N,),
        in_specs=[
            pl.BlockSpec((1, Lq, E), lambda n: (n, 0, 0)),   # x (decoder input / query)
            pl.BlockSpec((1, Lk, E), lambda n: (n, 0, 0)),   # key  (encoder output)
            pl.BlockSpec((1, Lk, E), lambda n: (n, 0, 0)),   # value (encoder output)
            pl.BlockSpec((1, 1, Lk), lambda n: (n, 0, 0)),   # source padding row (int32)
        ] + weight_specs,
        out_specs=pl.BlockSpec((1, Lq, E), lambda n: (n, 0, 0)),
        scratch_shapes=[pltpu.VMEM((Lq, E), jnp.float32)],   # attention-context scratch
        compiler_params=pltpu.CompilerParams(
            dimension_semantics=("parallel",)),              # N>=2 feeds both v7x cores
    )(x, key, value, src_pad, *weight_args)


# ------------------------------ parameter init ------------------------------

def init_decoder_block_params(key, embed_size, num_heads, forward_expansion):
    E, H = embed_size, num_heads
    D = E // H
    FE = forward_expansion
    inv_scale = 1.0 / math.sqrt(E)      # reference uses 1/sqrt(embed_size)
    counter = [0]

    def nxt():
        counter[0] += 1
        return jax.random.fold_in(key, counter[0])

    def dense(out_f, in_f):
        w = 0.05 * jax.random.normal(nxt(), (out_f, in_f), jnp.float32)
        b = 0.01 * jax.random.normal(nxt(), (out_f,), jnp.float32)
        return w, b

    eye_h = jnp.eye(H, dtype=jnp.float32)

    def mhsa():
        # Per-head nn.Linear(D, D) == block-diagonal [E, E] matmul in the lane-concat
        # layout; pre-transposed to [in, out]; score scale folded into the query branch.
        wk, bk = dense(D, D)
        wq, bq = dense(D, D)
        wv, bv = dense(D, D)
        wo, bo = dense(E, E)
        return dict(
            wq=(jnp.kron(eye_h, wq.T) * inv_scale).astype(WEIGHT_DTYPE),
            bq=(jnp.tile(bq, H) * inv_scale).reshape(1, E),
            wk=jnp.kron(eye_h, wk.T).astype(WEIGHT_DTYPE),
            bk=jnp.tile(bk, H).reshape(1, E),
            wv=jnp.kron(eye_h, wv.T).astype(WEIGHT_DTYPE),
            bv=jnp.tile(bv, H).reshape(1, E),
            wo=wo.T.astype(WEIGHT_DTYPE), bo=bo.reshape(1, E),
        )

    self_attn = mhsa()      # DecoderBlock.attention
    cross_attn = mhsa()     # DecoderBlock.transformer.attention
    w1, b1 = dense(FE * E, E)
    w2, b2 = dense(E, FE * E)

    return dict(
        # self-attention: q/k/v merged into one [E, 3E] weight (self-attn has key=query=value)
        wqkv_s=jnp.concatenate([self_attn["wq"], self_attn["wk"], self_attn["wv"]], axis=1),
        bqkv_s=jnp.concatenate([self_attn["bq"], self_attn["bk"], self_attn["bv"]], axis=1),
        wo_s=self_attn["wo"], bo_s=self_attn["bo"],
        ln_g=jnp.ones((1, E), jnp.float32), ln_b=jnp.zeros((1, E), jnp.float32),
        # cross-attention: separate q / k / v (key and value tensors may differ)
        wq_c=cross_attn["wq"], bq_c=cross_attn["bq"],
        wk_c=cross_attn["wk"], bk_c=cross_attn["bk"],
        wv_c=cross_attn["wv"], bv_c=cross_attn["bv"],
        wo_c=cross_attn["wo"], bo_c=cross_attn["bo"],
        ln1_g=jnp.ones((1, E), jnp.float32), ln1_b=jnp.zeros((1, E), jnp.float32),
        # feed-forward
        w1=w1.T.astype(WEIGHT_DTYPE), b1=b1.reshape(1, FE * E),
        w2=w2.T.astype(WEIGHT_DTYPE), b2=b2.reshape(1, E),
        ln2_g=jnp.ones((1, E), jnp.float32), ln2_b=jnp.zeros((1, E), jnp.float32),
    )


# ----------------------------------- main -----------------------------------

if __name__ == "__main__":
    EMBED, HEADS, FWD_EXP = 32, 4, 4
    N, L = 2, 8

    key0 = jax.random.PRNGKey(0)
    params = init_decoder_block_params(key0, EMBED, HEADS, FWD_EXP)

    kx, kenc = jax.random.split(jax.random.fold_in(key0, 1234))
    x = 0.1 * jax.random.normal(kx, (N, L, EMBED), jnp.float32)      # decoder input (query)
    enc = 0.1 * jax.random.normal(kenc, (N, L, EMBED), jnp.float32)  # encoder output (key & value)

    # source (padding) mask [N,1,1,L]: last source token of sample 1 is padding
    src_valid = jnp.ones((N, L), jnp.float32).at[1, -1].set(0.0)
    source_mask = src_valid[:, None, None, :]
    # target (causal) mask [N,1,L,L] (regenerated in-kernel; passed for interface parity)
    target_mask = jnp.broadcast_to(
        jnp.tril(jnp.ones((L, L), jnp.float32))[None, None, :, :], (N, 1, L, L))

    # TODO(synk): dropout layers run in eval mode (identity); training-mode stochastic
    # dropout is not implemented.

    fwd = jax.jit(functools.partial(decoder_block_forward,
                                    embed_size=EMBED, num_heads=HEADS))
    out = fwd(params, x, enc, enc, source_mask, target_mask)
    jax.block_until_ready(out)

    assert out.shape == (N, L, EMBED)
    assert bool(jnp.all(jnp.isfinite(out)))
    print("KERNEL_OK")
</pallas_src>

<mosaic_0001>
module attributes {stable_mosaic.version = 11 : i64} {
  func.func @_decoder_block_kernel(%arg0: i32, %arg1: memref<1x8x32xf32, #tpu.memory_space<vmem>>, %arg2: memref<1x8x32xf32, #tpu.memory_space<vmem>>, %arg3: memref<1x8x32xf32, #tpu.memory_space<vmem>>, %arg4: memref<1x1x8xi32, #tpu.memory_space<vmem>>, %arg5: memref<32x96xf32, #tpu.memory_space<vmem>>, %arg6: memref<1x96xf32, #tpu.memory_space<vmem>>, %arg7: memref<32x32xf32, #tpu.memory_space<vmem>>, %arg8: memref<1x32xf32, #tpu.memory_space<vmem>>, %arg9: memref<1x32xf32, #tpu.memory_space<vmem>>, %arg10: memref<1x32xf32, #tpu.memory_space<vmem>>, %arg11: memref<32x32xf32, #tpu.memory_space<vmem>>, %arg12: memref<1x32xf32, #tpu.memory_space<vmem>>, %arg13: memref<32x32xf32, #tpu.memory_space<vmem>>, %arg14: memref<1x32xf32, #tpu.memory_space<vmem>>, %arg15: memref<32x32xf32, #tpu.memory_space<vmem>>, %arg16: memref<1x32xf32, #tpu.memory_space<vmem>>, %arg17: memref<32x32xf32, #tpu.memory_space<vmem>>, %arg18: memref<1x32xf32, #tpu.memory_space<vmem>>, %arg19: memref<1x32xf32, #tpu.memory_space<vmem>>, %arg20: memref<1x32xf32, #tpu.memory_space<vmem>>, %arg21: memref<32x128xf32, #tpu.memory_space<vmem>>, %arg22: memref<1x128xf32, #tpu.memory_space<vmem>>, %arg23: memref<128x32xf32, #tpu.memory_space<vmem>>, %arg24: memref<1x32xf32, #tpu.memory_space<vmem>>, %arg25: memref<1x32xf32, #tpu.memory_space<vmem>>, %arg26: memref<1x32xf32, #tpu.memory_space<vmem>>, %arg27: memref<1x8x32xf32, #tpu.memory_space<vmem>>, %arg28: memref<8x32xf32, #tpu.memory_space<vmem>>) attributes {dimension_semantics = [#tpu.dimension_semantics<parallel>], iteration_bounds = array<i64: 2>, scalar_prefetch = 0 : i64, scratch_operands = 1 : i64, tpu.core_type = #tpu.core_type<tc>, window_params = [{transform_indices = @transform_0, window_bounds = array<i64: 1, 8, 32>}, {transform_indices = @transform_1, window_bounds = array<i64: 1, 8, 32>}, {transform_indices = @transform_2, window_bounds = array<i64: 1, 8, 32>}, {transform_indices = @transform_3, window_bounds = array<i64: 1, 1, 8>}, {pipeline_mode = #tpu.pipeline_mode<synchronous>, transform_indices = @transform_4, window_bounds = array<i64: 32, 96>}, {pipeline_mode = #tpu.pipeline_mode<synchronous>, transform_indices = @transform_5, window_bounds = array<i64: 1, 96>}, {pipeline_mode = #tpu.pipeline_mode<synchronous>, transform_indices = @transform_6, window_bounds = array<i64: 32, 32>}, {pipeline_mode = #tpu.pipeline_mode<synchronous>, transform_indices = @transform_7, window_bounds = array<i64: 1, 32>}, {pipeline_mode = #tpu.pipeline_mode<synchronous>, transform_indices = @transform_8, window_bounds = array<i64: 1, 32>}, {pipeline_mode = #tpu.pipeline_mode<synchronous>, transform_indices = @transform_9, window_bounds = array<i64: 1, 32>}, {pipeline_mode = #tpu.pipeline_mode<synchronous>, transform_indices = @transform_10, window_bounds = array<i64: 32, 32>}, {pipeline_mode = #tpu.pipeline_mode<synchronous>, transform_indices = @transform_11, window_bounds = array<i64: 1, 32>}, {pipeline_mode = #tpu.pipeline_mode<synchronous>, transform_indices = @transform_12, window_bounds = array<i64: 32, 32>}, {pipeline_mode = #tpu.pipeline_mode<synchronous>, transform_indices = @transform_13, window_bounds = array<i64: 1, 32>}, {pipeline_mode = #tpu.pipeline_mode<synchronous>, transform_indices = @transform_14, window_bounds = array<i64: 32, 32>}, {pipeline_mode = #tpu.pipeline_mode<synchronous>, transform_indices = @transform_15, window_bounds = array<i64: 1, 32>}, {pipeline_mode = #tpu.pipeline_mode<synchronous>, transform_indices = @transform_16, window_bounds = array<i64: 32, 32>}, {pipeline_mode = #tpu.pipeline_mode<synchronous>, transform_indices = @transform_17, window_bounds = array<i64: 1, 32>}, {pipeline_mode = #tpu.pipeline_mode<synchronous>, transform_indices = @transform_18, window_bounds = array<i64: 1, 32>}, {pipeline_mode = #tpu.pipeline_mode<synchronous>, transform_indices = @transform_19, window_bounds = array<i64: 1, 32>}, {pipeline_mode = #tpu.pipeline_mode<synchronous>, transform_indices = @transform_20, window_bounds = array<i64: 32, 128>}, {pipeline_mode = #tpu.pipeline_mode<synchronous>, transform_indices = @transform_21, window_bounds = array<i64: 1, 128>}, {pipeline_mode = #tpu.pipeline_mode<synchronous>, transform_indices = @transform_22, window_bounds = array<i64: 128, 32>}, {pipeline_mode = #tpu.pipeline_mode<synchronous>, transform_indices = @transform_23, window_bounds = array<i64: 1, 32>}, {pipeline_mode = #tpu.pipeline_mode<synchronous>, transform_indices = @transform_24, window_bounds = array<i64: 1, 32>}, {pipeline_mode = #tpu.pipeline_mode<synchronous>, transform_indices = @transform_25, window_bounds = array<i64: 1, 32>}, {transform_indices = @transform_26, window_bounds = array<i64: 1, 8, 32>}]} {
    %c0 = arith.constant 0 : index
    %c0_0 = arith.constant 0 : index
    %c0_1 = arith.constant 0 : index
    %0 = vector.load %arg1[%c0, %c0_0, %c0_1] : memref<1x8x32xf32, #tpu.memory_space<vmem>>, vector<1x8x32xf32>
    %1 = vector.shape_cast %0 : vector<1x8x32xf32> to vector<8x32xf32>
    %c0_2 = arith.constant 0 : index
    %c0_3 = arith.constant 0 : index
    %c0_4 = arith.constant 0 : index
    %2 = vector.load %arg2[%c0_2, %c0_3, %c0_4] : memref<1x8x32xf32, #tpu.memory_space<vmem>>, vector<1x8x32xf32>
    %3 = vector.shape_cast %2 : vector<1x8x32xf32> to vector<8x32xf32>
    %c0_5 = arith.constant 0 : index
    %c0_6 = arith.constant 0 : index
    %c0_7 = arith.constant 0 : index
    %4 = vector.load %arg3[%c0_5, %c0_6, %c0_7] : memref<1x8x32xf32, #tpu.memory_space<vmem>>, vector<1x8x32xf32>
    %5 = vector.shape_cast %4 : vector<1x8x32xf32> to vector<8x32xf32>
    %c0_8 = arith.constant 0 : index
    %c0_9 = arith.constant 0 : index
    %6 = vector.load %arg5[%c0_8, %c0_9] : memref<32x96xf32, #tpu.memory_space<vmem>>, vector<32x96xf32>
    %cst = arith.constant dense<0.000000e+00> : vector<8x96xf32>
    %7 = tpu.matmul %1, %6, %cst {dimension_numbers = #tpu.dot_dimension_numbers<[1], [0], [0], [1], [0, 0, 1, 1], [], []>} : vector<8x32xf32>, vector<32x96xf32>, vector<8x96xf32> -> vector<8x96xf32>
    %c0_10 = arith.constant 0 : index
    %c0_11 = arith.constant 0 : index
    %8 = vector.load %arg6[%c0_10, %c0_11] : memref<1x96xf32, #tpu.memory_space<vmem>>, vector<1x96xf32>
    %9 = vector.broadcast %8 : vector<1x96xf32> to vector<8x96xf32>
    %10 = arith.addf %7, %9 : vector<8x96xf32>
    %11 = vector.extract_strided_slice %10 {offsets = [0, 0], sizes = [8, 32], strides = [1, 1]} : vector<8x96xf32> to vector<8x32xf32>
    %12 = vector.extract_strided_slice %10 {offsets = [0, 32], sizes = [8, 32], strides = [1, 1]} : vector<8x96xf32> to vector<8x32xf32>
    %13 = vector.extract_strided_slice %10 {offsets = [0, 64], sizes = [8, 32], strides = [1, 1]} : vector<8x96xf32> to vector<8x32xf32>
    %14 = tpu.iota {dimensions = array<i32: 0>} : vector<8x8xi32>
    %15 = tpu.iota {dimensions = array<i32: 1>} : vector<8x8xi32>
    %16 = arith.cmpi sge, %14, %15 : vector<8x8xi32>
    %17 = vector.extract_strided_slice %11 {offsets = [0, 0], sizes = [8, 8], strides = [1, 1]} : vector<8x32xf32> to vector<8x8xf32>
    %18 = vector.extract_strided_slice %12 {offsets = [0, 0], sizes = [8, 8], strides = [1, 1]} : vector<8x32xf32> to vector<8x8xf32>
    %19 = vector.extract_strided_slice %13 {offsets = [0, 0], sizes = [8, 8], strides = [1, 1]} : vector<8x32xf32> to vector<8x8xf32>
    %cst_12 = arith.constant dense<0.000000e+00> : vector<8x8xf32>
    %20 = tpu.matmul %17, %18, %cst_12 {dimension_numbers = #tpu.dot_dimension_numbers<[1], [1], [0], [0], [0, 0, 1, 0], [], []>} : vector<8x8xf32>, vector<8x8xf32>, vector<8x8xf32> -> vector<8x8xf32>
    %cst_13 = arith.constant -1.000000e-30 : f32
    %21 = vector.broadcast %cst_13 : f32 to vector<8x8xf32>
    %22 = arith.select %16, %20, %21 : vector<8x8xi1>, vector<8x8xf32>
    %cst_14 = arith.constant dense<0xFF800000> : vector<8xf32>
    %23 = vector.multi_reduction <maximumf>, %22, %cst_14 [1] : vector<8x8xf32> to vector<8xf32>
    %24 = vector.shape_cast %23 : vector<8xf32> to vector<8x1xf32>
    %25 = vector.broadcast %24 : vector<8x1xf32> to vector<8x8xf32>
    %26 = arith.subf %22, %25 : vector<8x8xf32>
    %27 = math.exp %26 : vector<8x8xf32>
    %cst_15 = arith.constant dense<0.000000e+00> : vector<8xf32>
    %28 = vector.multi_reduction <add>, %27, %cst_15 [1] : vector<8x8xf32> to vector<8xf32>
    %29 = vector.shape_cast %28 : vector<8xf32> to vector<8x1xf32>
    %30 = vector.broadcast %29 : vector<8x1xf32> to vector<8x8xf32>
    %31 = arith.divf %27, %30 : vector<8x8xf32>
    %cst_16 = arith.constant dense<0.000000e+00> : vector<8x8xf32>
    %32 = tpu.matmul %31, %19, %cst_16 {dimension_numbers = #tpu.dot_dimension_numbers<[1], [0], [0], [1], [0, 0, 1, 1], [], []>} : vector<8x8xf32>, vector<8x8xf32>, vector<8x8xf32> -> vector<8x8xf32>
    %c0_17 = arith.constant 0 : index
    %c0_18 = arith.constant 0 : index
    %33 = vector.load %arg28[%c0_17, %c0_18] : memref<8x32xf32, #tpu.memory_space<vmem>>, vector<8x8xf32>
    tpu.vector_store %arg28[%c0_17, %c0_18], %32 {strides = array<i32>} : memref<8x32xf32, #tpu.memory_space<vmem>>, vector<8x8xf32>,
    %34 = vector.extract_strided_slice %11 {offsets = [0, 8], sizes = [8, 8], strides = [1, 1]} : vector<8x32xf32> to vector<8x8xf32>
    %35 = vector.extract_strided_slice %12 {offsets = [0, 8], sizes = [8, 8], strides = [1, 1]} : vector<8x32xf32> to vector<8x8xf32>
    %36 = vector.extract_strided_slice %13 {offsets = [0, 8], sizes = [8, 8], strides = [1, 1]} : vector<8x32xf32> to vector<8x8xf32>
    %cst_19 = arith.constant dense<0.000000e+00> : vector<8x8xf32>
    %37 = tpu.matmul %34, %35, %cst_19 {dimension_numbers = #tpu.dot_dimension_numbers<[1], [1], [0], [0], [0, 0, 1, 0], [], []>} : vector<8x8xf32>, vector<8x8xf32>, vector<8x8xf32> -> vector<8x8xf32>
    %cst_20 = arith.constant -1.000000e-30 : f32
    %38 = vector.broadcast %cst_20 : f32 to vector<8x8xf32>
    %39 = arith.select %16, %37, %38 : vector<8x8xi1>, vector<8x8xf32>
    %cst_21 = arith.constant dense<0xFF800000> : vector<8xf32>
    %40 = vector.multi_reduction <maximumf>, %39, %cst_21 [1] : vector<8x8xf32> to vector<8xf32>
    %41 = vector.shape_cast %40 : vector<8xf32> to vector<8x1xf32>
    %42 = vector.broadcast %41 : vector<8x1xf32> to vector<8x8xf32>
    %43 = arith.subf %39, %42 : vector<8x8xf32>
    %44 = math.exp %43 : vector<8x8xf32>
    %cst_22 = arith.constant dense<0.000000e+00> : vector<8xf32>
    %45 = vector.multi_reduction <add>, %44, %cst_22 [1] : vector<8x8xf32> to vector<8xf32>
    %46 = vector.shape_cast %45 : vector<8xf32> to vector<8x1xf32>
    %47 = vector.broadcast %46 : vector<8x1xf32> to vector<8x8xf32>
    %48 = arith.divf %44, %47 : vector<8x8xf32>
    %cst_23 = arith.constant dense<0.000000e+00> : vector<8x8xf32>
    %49 = tpu.matmul %48, %36, %cst_23 {dimension_numbers = #tpu.dot_dimension_numbers<[1], [0], [0], [1], [0, 0, 1, 1], [], []>} : vector<8x8xf32>, vector<8x8xf32>, vector<8x8xf32> -> vector<8x8xf32>
    %c0_24 = arith.constant 0 : index
    %c8 = arith.constant 8 : index
    %50 = vector.load %arg28[%c0_24, %c8] : memref<8x32xf32, #tpu.memory_space<vmem>>, vector<8x8xf32>
    tpu.vector_store %arg28[%c0_24, %c8], %49 {strides = array<i32>} : memref<8x32xf32, #tpu.memory_space<vmem>>, vector<8x8xf32>,
    %51 = vector.extract_strided_slice %11 {offsets = [0, 16], sizes = [8, 8], strides = [1, 1]} : vector<8x32xf32> to vector<8x8xf32>
    %52 = vector.extract_strided_slice %12 {offsets = [0, 16], sizes = [8, 8], strides = [1, 1]} : vector<8x32xf32> to vector<8x8xf32>
    %53 = vector.extract_strided_slice %13 {offsets = [0, 16], sizes = [8, 8], strides = [1, 1]} : vector<8x32xf32> to vector<8x8xf32>
    %cst_25 = arith.constant dense<0.000000e+00> : vector<8x8xf32>
    %54 = tpu.matmul %51, %52, %cst_25 {dimension_numbers = #tpu.dot_dimension_numbers<[1], [1], [0], [0], [0, 0, 1, 0], [], []>} : vector<8x8xf32>, vector<8x8xf32>, vector<8x8xf32> -> vector<8x8xf32>
    %cst_26 = arith.constant -1.000000e-30 : f32
    %55 = vector.broadcast %cst_26 : f32 to vector<8x8xf32>
    %56 = arith.select %16, %54, %55 : vector<8x8xi1>, vector<8x8xf32>
    %cst_27 = arith.constant dense<0xFF800000> : vector<8xf32>
    %57 = vector.multi_reduction <maximumf>, %56, %cst_27 [1] : vector<8x8xf32> to vector<8xf32>
    %58 = vector.shape_cast %57 : vector<8xf32> to vector<8x1xf32>
    %59 = vector.broadcast %58 : vector<8x1xf32> to vector<8x8xf32>
    %60 = arith.subf %56, %59 : vector<8x8xf32>
    %61 = math.exp %60 : vector<8x8xf32>
    %cst_28 = arith.constant dense<0.000000e+00> : vector<8xf32>
    %62 = vector.multi_reduction <add>, %61, %cst_28 [1] : vector<8x8xf32> to vector<8xf32>
    %63 = vector.shape_cast %62 : vector<8xf32> to vector<8x1xf32>
    %64 = vector.broadcast %63 : vector<8x1xf32> to vector<8x8xf32>
    %65 = arith.divf %61, %64 : vector<8x8xf32>
    %cst_29 = arith.constant dense<0.000000e+00> : vector<8x8xf32>
    %66 = tpu.matmul %65, %53, %cst_29 {dimension_numbers = #tpu.dot_dimension_numbers<[1], [0], [0], [1], [0, 0, 1, 1], [], []>} : vector<8x8xf32>, vector<8x8xf32>, vector<8x8xf32> -> vector<8x8xf32>
    %c0_30 = arith.constant 0 : index
    %c16 = arith.constant 16 : index
    %67 = vector.load %arg28[%c0_30, %c16] : memref<8x32xf32, #tpu.memory_space<vmem>>, vector<8x8xf32>
    tpu.vector_store %arg28[%c0_30, %c16], %66 {strides = array<i32>} : memref<8x32xf32, #tpu.memory_space<vmem>>, vector<8x8xf32>,
    %68 = vector.extract_strided_slice %11 {offsets = [0, 24], sizes = [8, 8], strides = [1, 1]} : vector<8x32xf32> to vector<8x8xf32>
    %69 = vector.extract_strided_slice %12 {offsets = [0, 24], sizes = [8, 8], strides = [1, 1]} : vector<8x32xf32> to vector<8x8xf32>
    %70 = vector.extract_strided_slice %13 {offsets = [0, 24], sizes = [8, 8], strides = [1, 1]} : vector<8x32xf32> to vector<8x8xf32>
    %cst_31 = arith.constant dense<0.000000e+00> : vector<8x8xf32>
    %71 = tpu.matmul %68, %69, %cst_31 {dimension_numbers = #tpu.dot_dimension_numbers<[1], [1], [0], [0], [0, 0, 1, 0], [], []>} : vector<8x8xf32>, vector<8x8xf32>, vector<8x8xf32> -> vector<8x8xf32>
    %cst_32 = arith.constant -1.000000e-30 : f32
    %72 = vector.broadcast %cst_32 : f32 to vector<8x8xf32>
    %73 = arith.select %16, %71, %72 : vector<8x8xi1>, vector<8x8xf32>
    %cst_33 = arith.constant dense<0xFF800000> : vector<8xf32>
    %74 = vector.multi_reduction <maximumf>, %73, %cst_33 [1] : vector<8x8xf32> to vector<8xf32>
    %75 = vector.shape_cast %74 : vector<8xf32> to vector<8x1xf32>
    %76 = vector.broadcast %75 : vector<8x1xf32> to vector<8x8xf32>
    %77 = arith.subf %73, %76 : vector<8x8xf32>
    %78 = math.exp %77 : vector<8x8xf32>
    %cst_34 = arith.constant dense<0.000000e+00> : vector<8xf32>
    %79 = vector.multi_reduction <add>, %78, %cst_34 [1] : vector<8x8xf32> to vector<8xf32>
    %80 = vector.shape_cast %79 : vector<8xf32> to vector<8x1xf32>
    %81 = vector.broadcast %80 : vector<8x1xf32> to vector<8x8xf32>
    %82 = arith.divf %78, %81 : vector<8x8xf32>
    %cst_35 = arith.constant dense<0.000000e+00> : vector<8x8xf32>
    %83 = tpu.matmul %82, %70, %cst_35 {dimension_numbers = #tpu.dot_dimension_numbers<[1], [0], [0], [1], [0, 0, 1, 1], [], []>} : vector<8x8xf32>, vector<8x8xf32>, vector<8x8xf32> -> vector<8x8xf32>
    %c0_36 = arith.constant 0 : index
    %c24 = arith.constant 24 : index
    %84 = vector.load %arg28[%c0_36, %c24] : memref<8x32xf32, #tpu.memory_space<vmem>>, vector<8x8xf32>
    tpu.vector_store %arg28[%c0_36, %c24], %83 {strides = array<i32>} : memref<8x32xf32, #tpu.memory_space<vmem>>, vector<8x8xf32>,
    %c0_37 = arith.constant 0 : index
    %c0_38 = arith.constant 0 : index
    %85 = vector.load %arg28[%c0_37, %c0_38] : memref<8x32xf32, #tpu.memory_space<vmem>>, vector<8x32xf32>
    %c0_39 = arith.constant 0 : index
    %c0_40 = arith.constant 0 : index
    %86 = vector.load %arg7[%c0_39, %c0_40] : memref<32x32xf32, #tpu.memory_space<vmem>>, vector<32x32xf32>
    %cst_41 = arith.constant dense<0.000000e+00> : vector<8x32xf32>
    %87 = tpu.matmul %85, %86, %cst_41 {dimension_numbers = #tpu.dot_dimension_numbers<[1], [0], [0], [1], [0, 0, 1, 1], [], []>} : vector<8x32xf32>, vector<32x32xf32>, vector<8x32xf32> -> vector<8x32xf32>
    %c0_42 = arith.constant 0 : index
    %c0_43 = arith.constant 0 : index
    %88 = vector.load %arg8[%c0_42, %c0_43] : memref<1x32xf32, #tpu.memory_space<vmem>>, vector<1x32xf32>
    %89 = vector.broadcast %88 : vector<1x32xf32> to vector<8x32xf32>
    %90 = arith.addf %87, %89 : vector<8x32xf32>
    %cst_44 = arith.constant dense<0.000000e+00> : vector<8xf32>
    %91 = vector.multi_reduction <add>, %90, %cst_44 [1] : vector<8x32xf32> to vector<8xf32>
    %92 = vector.shape_cast %91 : vector<8xf32> to vector<8x1xf32>
    %cst_45 = arith.constant 3.125000e-02 : f32
    %93 = vector.broadcast %cst_45 : f32 to vector<8x1xf32>
    %94 = arith.mulf %92, %93 : vector<8x1xf32>
    %95 = arith.mulf %90, %90 : vector<8x32xf32>
    %cst_46 = arith.constant dense<0.000000e+00> : vector<8xf32>
    %96 = vector.multi_reduction <add>, %95, %cst_46 [1] : vector<8x32xf32> to vector<8xf32>
    %97 = vector.shape_cast %96 : vector<8xf32> to vector<8x1xf32>
    %cst_47 = arith.constant 3.125000e-02 : f32
    %98 = vector.broadcast %cst_47 : f32 to vector<8x1xf32>
    %99 = arith.mulf %97, %98 : vector<8x1xf32>
    %100 = arith.mulf %94, %94 : vector<8x1xf32>
    %101 = arith.subf %99, %100 : vector<8x1xf32>
    %102 = vector.broadcast %94 : vector<8x1xf32> to vector<8x32xf32>
    %103 = arith.subf %90, %102 : vector<8x32xf32>
    %cst_48 = arith.constant 9.99999974E-6 : f32
    %104 = vector.broadcast %cst_48 : f32 to vector<8x1xf32>
    %105 = arith.addf %101, %104 : vector<8x1xf32>
    %106 = math.rsqrt %105 : vector<8x1xf32>
    %107 = vector.broadcast %106 : vector<8x1xf32> to vector<8x32xf32>
    %108 = arith.mulf %103, %107 : vector<8x32xf32>
    %c0_49 = arith.constant 0 : index
    %c0_50 = arith.constant 0 : index
    %109 = vector.load %arg9[%c0_49, %c0_50] : memref<1x32xf32, #tpu.memory_space<vmem>>, vector<1x32xf32>
    %110 = vector.broadcast %109 : vector<1x32xf32> to vector<8x32xf32>
    %111 = arith.mulf %108, %110 : vector<8x32xf32>
    %c0_51 = arith.constant 0 : index
    %c0_52 = arith.constant 0 : index
    %112 = vector.load %arg10[%c0_51, %c0_52] : memref<1x32xf32, #tpu.memory_space<vmem>>, vector<1x32xf32>
    %113 = vector.broadcast %112 : vector<1x32xf32> to vector<8x32xf32>
    %114 = arith.addf %111, %113 : vector<8x32xf32>
    %115 = arith.addf %114, %1 : vector<8x32xf32>
    %c0_53 = arith.constant 0 : index
    %c0_54 = arith.constant 0 : index
    %116 = vector.load %arg11[%c0_53, %c0_54] : memref<32x32xf32, #tpu.memory_space<vmem>>, vector<32x32xf32>
    %cst_55 = arith.constant dense<0.000000e+00> : vector<8x32xf32>
    %117 = tpu.matmul %115, %116, %cst_55 {dimension_numbers = #tpu.dot_dimension_numbers<[1], [0], [0], [1], [0, 0, 1, 1], [], []>} : vector<8x32xf32>, vector<32x32xf32>, vector<8x32xf32> -> vector<8x32xf32>
    %c0_56 = arith.constant 0 : index
    %c0_57 = arith.constant 0 : index
    %118 = vector.load %arg12[%c0_56, %c0_57] : memref<1x32xf32, #tpu.memory_space<vmem>>, vector<1x32xf32>
    %119 = vector.broadcast %118 : vector<1x32xf32> to vector<8x32xf32>
    %120 = arith.addf %117, %119 : vector<8x32xf32>
    %c0_58 = arith.constant 0 : index
    %c0_59 = arith.constant 0 : index
    %121 = vector.load %arg13[%c0_58, %c0_59] : memref<32x32xf32, #tpu.memory_space<vmem>>, vector<32x32xf32>
    %cst_60 = arith.constant dense<0.000000e+00> : vector<8x32xf32>
    %122 = tpu.matmul %3, %121, %cst_60 {dimension_numbers = #tpu.dot_dimension_numbers<[1], [0], [0], [1], [0, 0, 1, 1], [], []>} : vector<8x32xf32>, vector<32x32xf32>, vector<8x32xf32> -> vector<8x32xf32>
    %c0_61 = arith.constant 0 : index
    %c0_62 = arith.constant 0 : index
    %123 = vector.load %arg14[%c0_61, %c0_62] : memref<1x32xf32, #tpu.memory_space<vmem>>, vector<1x32xf32>
    %124 = vector.broadcast %123 : vector<1x32xf32> to vector<8x32xf32>
    %125 = arith.addf %122, %124 : vector<8x32xf32>
    %c0_63 = arith.constant 0 : index
    %c0_64 = arith.constant 0 : index
    %126 = vector.load %arg15[%c0_63, %c0_64] : memref<32x32xf32, #tpu.memory_space<vmem>>, vector<32x32xf32>
    %cst_65 = arith.constant dense<0.000000e+00> : vector<8x32xf32>
    %127 = tpu.matmul %5, %126, %cst_65 {dimension_numbers = #tpu.dot_dimension_numbers<[1], [0], [0], [1], [0, 0, 1, 1], [], []>} : vector<8x32xf32>, vector<32x32xf32>, vector<8x32xf32> -> vector<8x32xf32>
    %c0_66 = arith.constant 0 : index
    %c0_67 = arith.constant 0 : index
    %128 = vector.load %arg16[%c0_66, %c0_67] : memref<1x32xf32, #tpu.memory_space<vmem>>, vector<1x32xf32>
    %129 = vector.broadcast %128 : vector<1x32xf32> to vector<8x32xf32>
    %130 = arith.addf %127, %129 : vector<8x32xf32>
    %c0_68 = arith.constant 0 : index
    %c0_69 = arith.constant 0 : index
    %c0_70 = arith.constant 0 : index
    %131 = vector.load %arg4[%c0_68, %c0_69, %c0_70] : memref<1x1x8xi32, #tpu.memory_space<vmem>>, vector<1x1x8xi32>
    %132 = vector.shape_cast %131 : vector<1x1x8xi32> to vector<1x8xi32>
    %c0_i32 = arith.constant 0 : i32
    %133 = vector.broadcast %c0_i32 : i32 to vector<1x8xi32>
    %134 = arith.cmpi ne, %132, %133 : vector<1x8xi32>
    %135 = vector.extract_strided_slice %120 {offsets = [0, 0], sizes = [8, 8], strides = [1, 1]} : vector<8x32xf32> to vector<8x8xf32>
    %136 = vector.extract_strided_slice %125 {offsets = [0, 0], sizes = [8, 8], strides = [1, 1]} : vector<8x32xf32> to vector<8x8xf32>
    %137 = vector.extract_strided_slice %130 {offsets = [0, 0], sizes = [8, 8], strides = [1, 1]} : vector<8x32xf32> to vector<8x8xf32>
    %cst_71 = arith.constant dense<0.000000e+00> : vector<8x8xf32>
    %138 = tpu.matmul %135, %136, %cst_71 {dimension_numbers = #tpu.dot_dimension_numbers<[1], [1], [0], [0], [0, 0, 1, 0], [], []>} : vector<8x8xf32>, vector<8x8xf32>, vector<8x8xf32> -> vector<8x8xf32>
    %cst_72 = arith.constant -1.000000e-30 : f32
    %139 = vector.shape_cast %134 : vector<1x8xi1> to vector<1x8xi1>
    %140 = vector.broadcast %139 : vector<1x8xi1> to vector<8x8xi1>
    %141 = vector.broadcast %cst_72 : f32 to vector<8x8xf32>
    %142 = arith.select %140, %138, %141 : vector<8x8xi1>, vector<8x8xf32>
    %cst_73 = arith.constant dense<0xFF800000> : vector<8xf32>
    %143 = vector.multi_reduction <maximumf>, %142, %cst_73 [1] : vector<8x8xf32> to vector<8xf32>
    %144 = vector.shape_cast %143 : vector<8xf32> to vector<8x1xf32>
    %145 = vector.broadcast %144 : vector<8x1xf32> to vector<8x8xf32>
    %146 = arith.subf %142, %145 : vector<8x8xf32>
    %147 = math.exp %146 : vector<8x8xf32>
    %cst_74 = arith.constant dense<0.000000e+00> : vector<8xf32>
    %148 = vector.multi_reduction <add>, %147, %cst_74 [1] : vector<8x8xf32> to vector<8xf32>
    %149 = vector.shape_cast %148 : vector<8xf32> to vector<8x1xf32>
    %150 = vector.broadcast %149 : vector<8x1xf32> to vector<8x8xf32>
    %151 = arith.divf %147, %150 : vector<8x8xf32>
    %cst_75 = arith.constant dense<0.000000e+00> : vector<8x8xf32>
    %152 = tpu.matmul %151, %137, %cst_75 {dimension_numbers = #tpu.dot_dimension_numbers<[1], [0], [0], [1], [0, 0, 1, 1], [], []>} : vector<8x8xf32>, vector<8x8xf32>, vector<8x8xf32> -> vector<8x8xf32>
    %c0_76 = arith.constant 0 : index
    %c0_77 = arith.constant 0 : index
    %153 = vector.load %arg28[%c0_76, %c0_77] : memref<8x32xf32, #tpu.memory_space<vmem>>, vector<8x8xf32>
    tpu.vector_store %arg28[%c0_76, %c0_77], %152 {strides = array<i32>} : memref<8x32xf32, #tpu.memory_space<vmem>>, vector<8x8xf32>,
    %154 = vector.extract_strided_slice %120 {offsets = [0, 8], sizes = [8, 8], strides = [1, 1]} : vector<8x32xf32> to vector<8x8xf32>
    %155 = vector.extract_strided_slice %125 {offsets = [0, 8], sizes = [8, 8], strides = [1, 1]} : vector<8x32xf32> to vector<8x8xf32>
    %156 = vector.extract_strided_slice %130 {offsets = [0, 8], sizes = [8, 8], strides = [1, 1]} : vector<8x32xf32> to vector<8x8xf32>
    %cst_78 = arith.constant dense<0.000000e+00> : vector<8x8xf32>
    %157 = tpu.matmul %154, %155, %cst_78 {dimension_numbers = #tpu.dot_dimension_numbers<[1], [1], [0], [0], [0, 0, 1, 0], [], []>} : vector<8x8xf32>, vector<8x8xf32>, vector<8x8xf32> -> vector<8x8xf32>
    %cst_79 = arith.constant -1.000000e-30 : f32
    %158 = vector.shape_cast %134 : vector<1x8xi1> to vector<1x8xi1>
    %159 = vector.broadcast %158 : vector<1x8xi1> to vector<8x8xi1>
    %160 = vector.broadcast %cst_79 : f32 to vector<8x8xf32>
    %161 = arith.select %159, %157, %160 : vector<8x8xi1>, vector<8x8xf32>
    %cst_80 = arith.constant dense<0xFF800000> : vector<8xf32>
    %162 = vector.multi_reduction <maximumf>, %161, %cst_80 [1] : vector<8x8xf32> to vector<8xf32>
    %163 = vector.shape_cast %162 : vector<8xf32> to vector<8x1xf32>
    %164 = vector.broadcast %163 : vector<8x1xf32> to vector<8x8xf32>
    %165 = arith.subf %161, %164 : vector<8x8xf32>
    %166 = math.exp %165 : vector<8x8xf32>
    %cst_81 = arith.constant dense<0.000000e+00> : vector<8xf32>
    %167 = vector.multi_reduction <add>, %166, %cst_81 [1] : vector<8x8xf32> to vector<8xf32>
    %168 = vector.shape_cast %167 : vector<8xf32> to vector<8x1xf32>
    %169 = vector.broadcast %168 : vector<8x1xf32> to vector<8x8xf32>
    %170 = arith.divf %166, %169 : vector<8x8xf32>
    %cst_82 = arith.constant dense<0.000000e+00> : vector<8x8xf32>
    %171 = tpu.matmul %170, %156, %cst_82 {dimension_numbers = #tpu.dot_dimension_numbers<[1], [0], [0], [1], [0, 0, 1, 1], [], []>} : vector<8x8xf32>, vector<8x8xf32>, vector<8x8xf32> -> vector<8x8xf32>
    %c0_83 = arith.constant 0 : index
    %c8_84 = arith.constant 8 : index
    %172 = vector.load %arg28[%c0_83, %c8_84] : memref<8x32xf32, #tpu.memory_space<vmem>>, vector<8x8xf32>
    tpu.vector_store %arg28[%c0_83, %c8_84], %171 {strides = array<i32>} : memref<8x32xf32, #tpu.memory_space<vmem>>, vector<8x8xf32>,
    %173 = vector.extract_strided_slice %120 {offsets = [0, 16], sizes = [8, 8], strides = [1, 1]} : vector<8x32xf32> to vector<8x8xf32>
    %174 = vector.extract_strided_slice %125 {offsets = [0, 16], sizes = [8, 8], strides = [1, 1]} : vector<8x32xf32> to vector<8x8xf32>
    %175 = vector.extract_strided_slice %130 {offsets = [0, 16], sizes = [8, 8], strides = [1, 1]} : vector<8x32xf32> to vector<8x8xf32>
    %cst_85 = arith.constant dense<0.000000e+00> : vector<8x8xf32>
    %176 = tpu.matmul %173, %174, %cst_85 {dimension_numbers = #tpu.dot_dimension_numbers<[1], [1], [0], [0], [0, 0, 1, 0], [], []>} : vector<8x8xf32>, vector<8x8xf32>, vector<8x8xf32> -> vector<8x8xf32>
    %cst_86 = arith.constant -1.000000e-30 : f32
    %177 = vector.shape_cast %134 : vector<1x8xi1> to vector<1x8xi1>
    %178 = vector.broadcast %177 : vector<1x8xi1> to vector<8x8xi1>
    %179 = vector.broadcast %cst_86 : f32 to vector<8x8xf32>
    %180 = arith.select %178, %176, %179 : vector<8x8xi1>, vector<8x8xf32>
    %cst_87 = arith.constant dense<0xFF800000> : vector<8xf32>
    %181 = vector.multi_reduction <maximumf>, %180, %cst_87 [1] : vector<8x8xf32> to vector<8xf32>
    %182 = vector.shape_cast %181 : vector<8xf32> to vector<8x1xf32>
    %183 = vector.broadcast %182 : vector<8x1xf32> to vector<8x8xf32>
    %184 = arith.subf %180, %183 : vector<8x8xf32>
    %185 = math.exp %184 : vector<8x8xf32>
    %cst_88 = arith.constant dense<0.000000e+00> : vector<8xf32>
    %186 = vector.multi_reduction <add>, %185, %cst_88 [1] : vector<8x8xf32> to vector<8xf32>
    %187 = vector.shape_cast %186 : vector<8xf32> to vector<8x1xf32>
    %188 = vector.broadcast %187 : vector<8x1xf32> to vector<8x8xf32>
    %189 = arith.divf %185, %188 : vector<8x8xf32>
    %cst_89 = arith.constant dense<0.000000e+00> : vector<8x8xf32>
    %190 = tpu.matmul %189, %175, %cst_89 {dimension_numbers = #tpu.dot_dimension_numbers<[1], [0], [0], [1], [0, 0, 1, 1], [], []>} : vector<8x8xf32>, vector<8x8xf32>, vector<8x8xf32> -> vector<8x8xf32>
    %c0_90 = arith.constant 0 : index
    %c16_91 = arith.constant 16 : index
    %191 = vector.load %arg28[%c0_90, %c16_91] : memref<8x32xf32, #tpu.memory_space<vmem>>, vector<8x8xf32>
    tpu.vector_store %arg28[%c0_90, %c16_91], %190 {strides = array<i32>} : memref<8x32xf32, #tpu.memory_space<vmem>>, vector<8x8xf32>,
    %192 = vector.extract_strided_slice %120 {offsets = [0, 24], sizes = [8, 8], strides = [1, 1]} : vector<8x32xf32> to vector<8x8xf32>
    %193 = vector.extract_strided_slice %125 {offsets = [0, 24], sizes = [8, 8], strides = [1, 1]} : vector<8x32xf32> to vector<8x8xf32>
    %194 = vector.extract_strided_slice %130 {offsets = [0, 24], sizes = [8, 8], strides = [1, 1]} : vector<8x32xf32> to vector<8x8xf32>
    %cst_92 = arith.constant dense<0.000000e+00> : vector<8x8xf32>
    %195 = tpu.matmul %192, %193, %cst_92 {dimension_numbers = #tpu.dot_dimension_numbers<[1], [1], [0], [0], [0, 0, 1, 0], [], []>} : vector<8x8xf32>, vector<8x8xf32>, vector<8x8xf32> -> vector<8x8xf32>
    %cst_93 = arith.constant -1.000000e-30 : f32
    %196 = vector.shape_cast %134 : vector<1x8xi1> to vector<1x8xi1>
    %197 = vector.broadcast %196 : vector<1x8xi1> to vector<8x8xi1>
    %198 = vector.broadcast %cst_93 : f32 to vector<8x8xf32>
    %199 = arith.select %197, %195, %198 : vector<8x8xi1>, vector<8x8xf32>
    %cst_94 = arith.constant dense<0xFF800000> : vector<8xf32>
    %200 = vector.multi_reduction <maximumf>, %199, %cst_94 [1] : vector<8x8xf32> to vector<8xf32>
    %201 = vector.shape_cast %200 : vector<8xf32> to vector<8x1xf32>
    %202 = vector.broadcast %201 : vector<8x1xf32> to vector<8x8xf32>
    %203 = arith.subf %199, %202 : vector<8x8xf32>
    %204 = math.exp %203 : vector<8x8xf32>
    %cst_95 = arith.constant dense<0.000000e+00> : vector<8xf32>
    %205 = vector.multi_reduction <add>, %204, %cst_95 [1] : vector<8x8xf32> to vector<8xf32>
    %206 = vector.shape_cast %205 : vector<8xf32> to vector<8x1xf32>
    %207 = vector.broadcast %206 : vector<8x1xf32> to vector<8x8xf32>
    %208 = arith.divf %204, %207 : vector<8x8xf32>
    %cst_96 = arith.constant dense<0.000000e+00> : vector<8x8xf32>
    %209 = tpu.matmul %208, %194, %cst_96 {dimension_numbers = #tpu.dot_dimension_numbers<[1], [0], [0], [1], [0, 0, 1, 1], [], []>} : vector<8x8xf32>, vector<8x8xf32>, vector<8x8xf32> -> vector<8x8xf32>
    %c0_97 = arith.constant 0 : index
    %c24_98 = arith.constant 24 : index
    %210 = vector.load %arg28[%c0_97, %c24_98] : memref<8x32xf32, #tpu.memory_space<vmem>>, vector<8x8xf32>
    tpu.vector_store %arg28[%c0_97, %c24_98], %209 {strides = array<i32>} : memref<8x32xf32, #tpu.memory_space<vmem>>, vector<8x8xf32>,
    %c0_99 = arith.constant 0 : index
    %c0_100 = arith.constant 0 : index
    %211 = vector.load %arg28[%c0_99, %c0_100] : memref<8x32xf32, #tpu.memory_space<vmem>>, vector<8x32xf32>
    %c0_101 = arith.constant 0 : index
    %c0_102 = arith.constant 0 : index
    %212 = vector.load %arg17[%c0_101, %c0_102] : memref<32x32xf32, #tpu.memory_space<vmem>>, vector<32x32xf32>
    %cst_103 = arith.constant dense<0.000000e+00> : vector<8x32xf32>
    %213 = tpu.matmul %211, %212, %cst_103 {dimension_numbers = #tpu.dot_dimension_numbers<[1], [0], [0], [1], [0, 0, 1, 1], [], []>} : vector<8x32xf32>, vector<32x32xf32>, vector<8x32xf32> -> vector<8x32xf32>
    %c0_104 = arith.constant 0 : index
    %c0_105 = arith.constant 0 : index
    %214 = vector.load %arg18[%c0_104, %c0_105] : memref<1x32xf32, #tpu.memory_space<vmem>>, vector<1x32xf32>
    %215 = vector.broadcast %214 : vector<1x32xf32> to vector<8x32xf32>
    %216 = arith.addf %213, %215 : vector<8x32xf32>
    %217 = arith.addf %216, %115 : vector<8x32xf32>
    %cst_106 = arith.constant dense<0.000000e+00> : vector<8xf32>
    %218 = vector.multi_reduction <add>, %217, %cst_106 [1] : vector<8x32xf32> to vector<8xf32>
    %219 = vector.shape_cast %218 : vector<8xf32> to vector<8x1xf32>
    %cst_107 = arith.constant 3.125000e-02 : f32
    %220 = vector.broadcast %cst_107 : f32 to vector<8x1xf32>
    %221 = arith.mulf %219, %220 : vector<8x1xf32>
    %222 = arith.mulf %217, %217 : vector<8x32xf32>
    %cst_108 = arith.constant dense<0.000000e+00> : vector<8xf32>
    %223 = vector.multi_reduction <add>, %222, %cst_108 [1] : vector<8x32xf32> to vector<8xf32>
    %224 = vector.shape_cast %223 : vector<8xf32> to vector<8x1xf32>
    %cst_109 = arith.constant 3.125000e-02 : f32
    %225 = vector.broadcast %cst_109 : f32 to vector<8x1xf32>
    %226 = arith.mulf %224, %225 : vector<8x1xf32>
    %227 = arith.mulf %221, %221 : vector<8x1xf32>
    %228 = arith.subf %226, %227 : vector<8x1xf32>
    %229 = vector.broadcast %221 : vector<8x1xf32> to vector<8x32xf32>
    %230 = arith.subf %217, %229 : vector<8x32xf32>
    %cst_110 = arith.constant 9.99999974E-6 : f32
    %231 = vector.broadcast %cst_110 : f32 to vector<8x1xf32>
    %232 = arith.addf %228, %231 : vector<8x1xf32>
    %233 = math.rsqrt %232 : vector<8x1xf32>
    %234 = vector.broadcast %233 : vector<8x1xf32> to vector<8x32xf32>
    %235 = arith.mulf %230, %234 : vector<8x32xf32>
    %c0_111 = arith.constant 0 : index
    %c0_112 = arith.constant 0 : index
    %236 = vector.load %arg19[%c0_111, %c0_112] : memref<1x32xf32, #tpu.memory_space<vmem>>, vector<1x32xf32>
    %237 = vector.broadcast %236 : vector<1x32xf32> to vector<8x32xf32>
    %238 = arith.mulf %235, %237 : vector<8x32xf32>
    %c0_113 = arith.constant 0 : index
    %c0_114 = arith.constant 0 : index
    %239 = vector.load %arg20[%c0_113, %c0_114] : memref<1x32xf32, #tpu.memory_space<vmem>>, vector<1x32xf32>
    %240 = vector.broadcast %239 : vector<1x32xf32> to vector<8x32xf32>
    %241 = arith.addf %238, %240 : vector<8x32xf32>
    %c0_115 = arith.constant 0 : index
    %c0_116 = arith.constant 0 : index
    %242 = vector.load %arg21[%c0_115, %c0_116] : memref<32x128xf32, #tpu.memory_space<vmem>>, vector<32x128xf32>
    %cst_117 = arith.constant dense<0.000000e+00> : vector<8x128xf32>
    %243 = tpu.matmul %241, %242, %cst_117 {dimension_numbers = #tpu.dot_dimension_numbers<[1], [0], [0], [1], [0, 0, 1, 1], [], []>} : vector<8x32xf32>, vector<32x128xf32>, vector<8x128xf32> -> vector<8x128xf32>
    %c0_118 = arith.constant 0 : index
    %c0_119 = arith.constant 0 : index
    %244 = vector.load %arg22[%c0_118, %c0_119] : memref<1x128xf32, #tpu.memory_space<vmem>>, vector<1x128xf32>
    %245 = vector.broadcast %244 : vector<1x128xf32> to vector<8x128xf32>
    %246 = arith.addf %243, %245 : vector<8x128xf32>
    %cst_120 = arith.constant 0.000000e+00 : f32
    %247 = vector.broadcast %cst_120 : f32 to vector<8x128xf32>
    %248 = arith.maximumf %246, %247 : vector<8x128xf32>
    %c0_121 = arith.constant 0 : index
    %c0_122 = arith.constant 0 : index
    %249 = vector.load %arg23[%c0_121, %c0_122] : memref<128x32xf32, #tpu.memory_space<vmem>>, vector<128x32xf32>
    %cst_123 = arith.constant dense<0.000000e+00> : vector<8x32xf32>
    %250 = tpu.matmul %248, %249, %cst_123 {dimension_numbers = #tpu.dot_dimension_numbers<[1], [0], [0], [1], [0, 0, 1, 1], [], []>} : vector<8x128xf32>, vector<128x32xf32>, vector<8x32xf32> -> vector<8x32xf32>
    %c0_124 = arith.constant 0 : index
    %c0_125 = arith.constant 0 : index
    %251 = vector.load %arg24[%c0_124, %c0_125] : memref<1x32xf32, #tpu.memory_space<vmem>>, vector<1x32xf32>
    %252 = vector.broadcast %251 : vector<1x32xf32> to vector<8x32xf32>
    %253 = arith.addf %250, %252 : vector<8x32xf32>
    %254 = arith.addf %253, %241 : vector<8x32xf32>
    %cst_126 = arith.constant dense<0.000000e+00> : vector<8xf32>
    %255 = vector.multi_reduction <add>, %254, %cst_126 [1] : vector<8x32xf32> to vector<8xf32>
    %256 = vector.shape_cast %255 : vector<8xf32> to vector<8x1xf32>
    %cst_127 = arith.constant 3.125000e-02 : f32
    %257 = vector.broadcast %cst_127 : f32 to vector<8x1xf32>
    %258 = arith.mulf %256, %257 : vector<8x1xf32>
    %259 = arith.mulf %254, %254 : vector<8x32xf32>
    %cst_128 = arith.constant dense<0.000000e+00> : vector<8xf32>
    %260 = vector.multi_reduction <add>, %259, %cst_128 [1] : vector<8x32xf32> to vector<8xf32>
    %261 = vector.shape_cast %260 : vector<8xf32> to vector<8x1xf32>
    %cst_129 = arith.constant 3.125000e-02 : f32
    %262 = vector.broadcast %cst_129 : f32 to vector<8x1xf32>
    %263 = arith.mulf %261, %262 : vector<8x1xf32>
    %264 = arith.mulf %258, %258 : vector<8x1xf32>
    %265 = arith.subf %263, %264 : vector<8x1xf32>
    %266 = vector.broadcast %258 : vector<8x1xf32> to vector<8x32xf32>
    %267 = arith.subf %254, %266 : vector<8x32xf32>
    %cst_130 = arith.constant 9.99999974E-6 : f32
    %268 = vector.broadcast %cst_130 : f32 to vector<8x1xf32>
    %269 = arith.addf %265, %268 : vector<8x1xf32>
    %270 = math.rsqrt %269 : vector<8x1xf32>
    %271 = vector.broadcast %270 : vector<8x1xf32> to vector<8x32xf32>
    %272 = arith.mulf %267, %271 : vector<8x32xf32>
    %c0_131 = arith.constant 0 : index
    %c0_132 = arith.constant 0 : index
    %273 = vector.load %arg25[%c0_131, %c0_132] : memref<1x32xf32, #tpu.memory_space<vmem>>, vector<1x32xf32>
    %274 = vector.broadcast %273 : vector<1x32xf32> to vector<8x32xf32>
    %275 = arith.mulf %272, %274 : vector<8x32xf32>
    %c0_133 = arith.constant 0 : index
    %c0_134 = arith.constant 0 : index
    %276 = vector.load %arg26[%c0_133, %c0_134] : memref<1x32xf32, #tpu.memory_space<vmem>>, vector<1x32xf32>
    %277 = vector.broadcast %276 : vector<1x32xf32> to vector<8x32xf32>
    %278 = arith.addf %275, %277 : vector<8x32xf32>
    %c0_135 = arith.constant 0 : index
    %c0_136 = arith.constant 0 : index
    %c0_137 = arith.constant 0 : index
    %279 = vector.load %arg27[%c0_135, %c0_136, %c0_137] : memref<1x8x32xf32, #tpu.memory_space<vmem>>, vector<1x8x32xf32>
    %280 = vector.shape_cast %279 : vector<1x8x32xf32> to vector<8x32xf32>
    %281 = vector.shape_cast %278 : vector<8x32xf32> to vector<1x8x32xf32>
    tpu.vector_store %arg27[%c0_135, %c0_136, %c0_137], %281 {strides = array<i32>} : memref<1x8x32xf32, #tpu.memory_space<vmem>>, vector<1x8x32xf32>,
    return
  }
  func.func @transform_0(%arg0: i32) -> (i32, i32, i32) {
    %c0_i32 = arith.constant 0 : i32
    %c0_i32_0 = arith.constant 0 : i32
    %c0_i32_1 = arith.constant 0 : i32
    return %arg0, %c0_i32, %c0_i32_0 : i32, i32, i32
  }
  func.func @transform_1(%arg0: i32) -> (i32, i32, i32) {
    %c0_i32 = arith.constant 0 : i32
    %c0_i32_0 = arith.constant 0 : i32
    %c0_i32_1 = arith.constant 0 : i32
    return %arg0, %c0_i32, %c0_i32_0 : i32, i32, i32
  }
  func.func @transform_2(%arg0: i32) -> (i32, i32, i32) {
    %c0_i32 = arith.constant 0 : i32
    %c0_i32_0 = arith.constant 0 : i32
    %c0_i32_1 = arith.constant 0 : i32
    return %arg0, %c0_i32, %c0_i32_0 : i32, i32, i32
  }
  func.func @transform_3(%arg0: i32) -> (i32, i32, i32) {
    %c0_i32 = arith.constant 0 : i32
    %c0_i32_0 = arith.constant 0 : i32
    %c0_i32_1 = arith.constant 0 : i32
    return %arg0, %c0_i32, %c0_i32_0 : i32, i32, i32
  }
  func.func @transform_4(%arg0: i32) -> (i32, i32) {
    %c0_i32 = arith.constant 0 : i32
    %c0_i32_0 = arith.constant 0 : i32
    %c0_i32_1 = arith.constant 0 : i32
    return %c0_i32, %c0_i32_0 : i32, i32
  }
  func.func @transform_5(%arg0: i32) -> (i32, i32) {
    %c0_i32 = arith.constant 0 : i32
    %c0_i32_0 = arith.constant 0 : i32
    %c0_i32_1 = arith.constant 0 : i32
    return %c0_i32, %c0_i32_0 : i32, i32
  }
  func.func @transform_6(%arg0: i32) -> (i32, i32) {
    %c0_i32 = arith.constant 0 : i32
    %c0_i32_0 = arith.constant 0 : i32
    %c0_i32_1 = arith.constant 0 : i32
    return %c0_i32, %c0_i32_0 : i32, i32
  }
  func.func @transform_7(%arg0: i32) -> (i32, i32) {
    %c0_i32 = arith.constant 0 : i32
    %c0_i32_0 = arith.constant 0 : i32
    %c0_i32_1 = arith.constant 0 : i32
    return %c0_i32, %c0_i32_0 : i32, i32
  }
  func.func @transform_8(%arg0: i32) -> (i32, i32) {
    %c0_i32 = arith.constant 0 : i32
    %c0_i32_0 = arith.constant 0 : i32
    %c0_i32_1 = arith.constant 0 : i32
    return %c0_i32, %c0_i32_0 : i32, i32
  }
  func.func @transform_9(%arg0: i32) -> (i32, i32) {
    %c0_i32 = arith.constant 0 : i32
    %c0_i32_0 = arith.constant 0 : i32
    %c0_i32_1 = arith.constant 0 : i32
    return %c0_i32, %c0_i32_0 : i32, i32
  }
  func.func @transform_10(%arg0: i32) -> (i32, i32) {
    %c0_i32 = arith.constant 0 : i32
    %c0_i32_0 = arith.constant 0 : i32
    %c0_i32_1 = arith.constant 0 : i32
    return %c0_i32, %c0_i32_0 : i32, i32
  }
  func.func @transform_11(%arg0: i32) -> (i32, i32) {
    %c0_i32 = arith.constant 0 : i32
    %c0_i32_0 = arith.constant 0 : i32
    %c0_i32_1 = arith.constant 0 : i32
    return %c0_i32, %c0_i32_0 : i32, i32
  }
  func.func @transform_12(%arg0: i32) -> (i32, i32) {
    %c0_i32 = arith.constant 0 : i32
    %c0_i32_0 = arith.constant 0 : i32
    %c0_i32_1 = arith.constant 0 : i32
    return %c0_i32, %c0_i32_0 : i32, i32
  }
  func.func @transform_13(%arg0: i32) -> (i32, i32) {
    %c0_i32 = arith.constant 0 : i32
    %c0_i32_0 = arith.constant 0 : i32
    %c0_i32_1 = arith.constant 0 : i32
    return %c0_i32, %c0_i32_0 : i32, i32
  }
  func.func @transform_14(%arg0: i32) -> (i32, i32) {
    %c0_i32 = arith.constant 0 : i32
    %c0_i32_0 = arith.constant 0 : i32
    %c0_i32_1 = arith.constant 0 : i32
    return %c0_i32, %c0_i32_0 : i32, i32
  }
  func.func @transform_15(%arg0: i32) -> (i32, i32) {
    %c0_i32 = arith.constant 0 : i32
    %c0_i32_0 = arith.constant 0 : i32
    %c0_i32_1 = arith.constant 0 : i32
    return %c0_i32, %c0_i32_0 : i32, i32
  }
  func.func @transform_16(%arg0: i32) -> (i32, i32) {
    %c0_i32 = arith.constant 0 : i32
    %c0_i32_0 = arith.constant 0 : i32
    %c0_i32_1 = arith.constant 0 : i32
    return %c0_i32, %c0_i32_0 : i32, i32
  }
  func.func @transform_17(%arg0: i32) -> (i32, i32) {
    %c0_i32 = arith.constant 0 : i32
    %c0_i32_0 = arith.constant 0 : i32
    %c0_i32_1 = arith.constant 0 : i32
    return %c0_i32, %c0_i32_0 : i32, i32
  }
  func.func @transform_18(%arg0: i32) -> (i32, i32) {
    %c0_i32 = arith.constant 0 : i32
    %c0_i32_0 = arith.constant 0 : i32
    %c0_i32_1 = arith.constant 0 : i32
    return %c0_i32, %c0_i32_0 : i32, i32
  }
  func.func @transform_19(%arg0: i32) -> (i32, i32) {
    %c0_i32 = arith.constant 0 : i32
    %c0_i32_0 = arith.constant 0 : i32
    %c0_i32_1 = arith.constant 0 : i32
    return %c0_i32, %c0_i32_0 : i32, i32
  }
  func.func @transform_20(%arg0: i32) -> (i32, i32) {
    %c0_i32 = arith.constant 0 : i32
    %c0_i32_0 = arith.constant 0 : i32
    %c0_i32_1 = arith.constant 0 : i32
    return %c0_i32, %c0_i32_0 : i32, i32
  }
  func.func @transform_21(%arg0: i32) -> (i32, i32) {
    %c0_i32 = arith.constant 0 : i32
    %c0_i32_0 = arith.constant 0 : i32
    %c0_i32_1 = arith.constant 0 : i32
    return %c0_i32, %c0_i32_0 : i32, i32
  }
  func.func @transform_22(%arg0: i32) -> (i32, i32) {
    %c0_i32 = arith.constant 0 : i32
    %c0_i32_0 = arith.constant 0 : i32
    %c0_i32_1 = arith.constant 0 : i32
    return %c0_i32, %c0_i32_0 : i32, i32
  }
  func.func @transform_23(%arg0: i32) -> (i32, i32) {
    %c0_i32 = arith.constant 0 : i32
    %c0_i32_0 = arith.constant 0 : i32
    %c0_i32_1 = arith.constant 0 : i32
    return %c0_i32, %c0_i32_0 : i32, i32
  }
  func.func @transform_24(%arg0: i32) -> (i32, i32) {
    %c0_i32 = arith.constant 0 : i32
    %c0_i32_0 = arith.constant 0 : i32
    %c0_i32_1 = arith.constant 0 : i32
    return %c0_i32, %c0_i32_0 : i32, i32
  }
  func.func @transform_25(%arg0: i32) -> (i32, i32) {
    %c0_i32 = arith.constant 0 : i32
    %c0_i32_0 = arith.constant 0 : i32
    %c0_i32_1 = arith.constant 0 : i32
    return %c0_i32, %c0_i32_0 : i32, i32
  }
  func.func @transform_26(%arg0: i32) -> (i32, i32, i32) {
    %c0_i32 = arith.constant 0 : i32
    %c0_i32_0 = arith.constant 0 : i32
    %c0_i32_1 = arith.constant 0 : i32
    return %arg0, %c0_i32, %c0_i32_0 : i32, i32, i32
  }
}

</mosaic_0001>

<bundles_post_ra>
// kernel: decoder_block_forward.1
= control target key start
LH: loop header
LB: loop body
LE: loop exit
PB: predicated region body
PF: predicated region fallthrough
CT: control target
= control target key end

     0   :  { %s3787_s0 = inlined_call_operand.vmem [shape: f32[2,8,32], index: 0, kind: input, shape index: {}]   ;;  %s3788_s1 = inlined_call_operand.hbm [shape: f32[2,8,32], index: 1, kind: input, shape index: {}]   ;;  %s3789_s2 = inlined_call_operand.hbm [shape: f32[2,8,32], index: 2, kind: input, shape index: {}]   ;;  %s3790_s3 = inlined_call_operand.vmem [shape: s32[2,1,8], index: 3, kind: input, shape index: {}]   ;;  %s3791_s4 = inlined_call_operand.vmem [shape: f32[32,96], index: 4, kind: input, shape index: {}]   ;;  %s3792_s5 = inlined_call_operand.vmem [shape: f32[1,96], index: 5, kind: input, shape index: {}]   ;;  %s3793_s6 = inlined_call_operand.vmem [shape: f32[32,32], index: 6, kind: input, shape index: {}]   ;;  %s3794_s7 = inlined_call_operand.vmem [shape: f32[1,32], index: 7, kind: input, shape index: {}]   ;;  %s3795_s8 = inlined_call_operand.vmem [shape: f32[1,32], index: 8, kind: input, shape index: {}]   ;;  %s3796_s9 = inlined_call_operand.vmem [shape: f32[1,32], index: 9, kind: input, shape index: {}]   ;;  %s3797_s10 = inlined_call_operand.vmem [shape: f32[32,32], index: 10, kind: input, shape index: {}]   ;;  %s3798_s11 = inlined_call_operand.vmem [shape: f32[1,32], index: 11, kind: input, shape index: {}]   ;;  %s3799_s12 = inlined_call_operand.vmem [shape: f32[32,32], index: 12, kind: input, shape index: {}]   ;;  %s3800_s13 = inlined_call_operand.hbm [shape: f32[1,32], index: 13, kind: input, shape index: {}]   ;;  %s3801_s14 = inlined_call_operand.vmem [shape: f32[32,32], index: 14, kind: input, shape index: {}]   ;;  %s3802_s15 = inlined_call_operand.hbm [shape: f32[1,32], index: 15, kind: input, shape index: {}]   ;;  %s3803_s16 = inlined_call_operand.hbm [shape: f32[32,32], index: 16, kind: input, shape index: {}]   ;;  %s3804_s17 = inlined_call_operand.hbm [shape: f32[1,32], index: 17, kind: input, shape index: {}]   ;;  %s3805_s18 = inlined_call_operand.hbm [shape: f32[1,32], index: 18, kind: input, shape index: {}]   ;;  %s3806_s19 = inlined_call_operand.hbm [shape: f32[1,32], index: 19, kind: input, shape index: {}]   ;;  %s3807_s20 = inlined_call_operand.hbm [shape: f32[32,128], index: 20, kind: input, shape index: {}]   ;;  %s3808_s21 = inlined_call_operand.hbm [shape: f32[1,128], index: 21, kind: input, shape index: {}]   ;;  %s3809_s22 = inlined_call_operand.vmem [shape: f32[128,32], index: 22, kind: input, shape index: {}]   ;;  %s3810_s23 = inlined_call_operand.hbm [shape: f32[1,32], index: 23, kind: input, shape index: {}]   ;;  %s3811_s24 = inlined_call_operand.hbm [shape: f32[1,32], index: 24, kind: input, shape index: {}]   ;;  %s3812_s25 = inlined_call_operand.hbm [shape: f32[1,32], index: 25, kind: input, shape index: {}]   ;;  %s3813_s26 = inlined_call_operand.hbm [shape: f32[2,8,32], index: 26, kind: output, shape index: {}]  }
   0x1   :  { %3825 = sst [smem:[#allocation36_spill]] %s3787_s0 }
   0x2   :  { %3826 = sst [smem:[#allocation37_spill]] %s3788_s1 }
   0x3   :  { %3827 = sst [smem:[#allocation38_spill]] %s3789_s2 }
   0x4   :  { %3828 = sst [smem:[#allocation39_spill]] %s3790_s3 }
   0x5   :  { %3829 = sst [smem:[#allocation40_spill]] %s3791_s4 }
   0x6   :  { %3830 = sst [smem:[#allocation41_spill]] %s3792_s5 }
   0x7   :  { %3831 = sst [smem:[#allocation42_spill]] %s3793_s6 }
   0x8   :  { %3832 = sst [smem:[#allocation43_spill]] %s3794_s7 }
   0x9   :  { %3833 = sst [smem:[#allocation44_spill]] %s3795_s8 }
   0xa   :  { %3834 = sst [smem:[#allocation45_spill]] %s3796_s9 }
   0xb   :  { %3835 = sst [smem:[#allocation46_spill]] %s3797_s10 }
   0xc   :  { %3836 = sst [smem:[#allocation47_spill]] %s3800_s13 }
   0xd   :  { %3837 = sst [smem:[#allocation48_spill]] %s3801_s14 }
   0xe   :  { %3838 = sst [smem:[#allocation49_spill]] %s3802_s15 }
   0xf   :  { %3839 = sst [smem:[#allocation50_spill]] %s3803_s16 }
  0x10   :  { %3840 = sst [smem:[#allocation51_spill]] %s3804_s17 }
  0x11   :  { %3841 = sst [smem:[#allocation52_spill]] %s3805_s18 }
  0x12   :  { %3842 = sst [smem:[#allocation53_spill]] %s3806_s19 }
  0x13   :  { %3843 = sst [smem:[#allocation54_spill]] %s3807_s20 }
  0x14   :  { %3844 = sst [smem:[#allocation55_spill]] %s3808_s21 }
  0x15   :  { %3845 = sst [smem:[#allocation56_spill]] %s3809_s22 }
  0x16   :  { %3846 = sst [smem:[#allocation57_spill]] %s3810_s23 }
  0x17   :  { %3847 = sst [smem:[#allocation58_spill]] %s3811_s24 }
  0x18   :  { %3848 = sst [smem:[#allocation59_spill]] %s3812_s25 }
  0x19   :  { %3849 = sst [smem:[#allocation60_spill]] %s3813_s26 }
  0x1a   :  { %31 = vsyncpa [#allocation4], 0 }
  0x1b   :  { %33 = vsyncpa [#allocation4 + $0x1], 0 }
  0x1c   :  { %34 = vsyncpa [#allocation7], 0 }
  0x1d   :  { %36 = vsyncpa [#allocation7 + $0x1], 0 }
  0x1e   :  { %37 = vsyncpa [#allocation10], 0 }
  0x1f   :  { %38 = vsyncpa [#allocation13], 0 }
  0x20   :  { %39 = vsyncpa [#allocation16], 0 }
  0x21   :  { %40 = vsyncpa [#allocation19], 0 }
  0x22   :  { %41 = vsyncpa [#allocation22], 0 }
  0x23   :  { %42 = vsyncpa [#allocation5], 0 }
  0x24   :  { %44 = vsyncpa [#allocation5 + $0x1], 0  ;;  %s3268_s27 = smov 0   ;;  %s3270_s3 = smov 0  }
  0x25   :  { %s3272_s7 = smov 0   ;;  %s3274_s28 = smov 0  }
  0x26 LB: > { %3850 = sst [smem:[#allocation34_spill]] %s3099_s7  ;;  %s3292_s0 = sadd.s32 4294967295, %s3103_s28   ;;  %s3103_s28 = sphi %s3274_s28, %s3893_s28   ;;  %s3099_s7 = sphi %s3272_s7, %s3890_s7   ;;  %s3095_s3 = sphi %s3270_s3, %s3892_s3   ;;  %s3091_s27 = sphi %s3268_s27, %s3891_s27  }
  0x27   : > { %s3851_s13 = sld [smem:[#allocation47_spill]]  ;;  %p2320_p0 = scmp.ge.s32.totalorder %s3103_s28, 1 }
  0x28   : > { %p97_p1 = scmp.eq.s32.totalorder %s3292_s0, 0  ;;  %p647_p2 = scmp.lt.s32.totalorder %s3103_s28, 3 }
  0x29   : > { %s3105_s30 = smov [#allocation8]   ;;  %s3853_s15 = sld [smem:[#allocation49_spill]] }
  0x2a   : > { %p3297_p3 = pnand %p2320_p0, %p647_p2  ;;  %s688_s2 = sshll.u32 %s3105_s30, 4  ;;  %s689_s2 = int_to_ptr.vmem [resolvable:$true] %s688_s2 }
  0x2b   : > { %s3106_s8 = smov [#allocation9]   ;;  %s3855_s17 = sld [smem:[#allocation51_spill]] }
  0x2c   : > { %p2438_p5 = pneg %p3297_p3  ;;  %s703_s4 = sshll.u32 %s3106_s8, 4  ;;  %s704_s4 = int_to_ptr.vmem [resolvable:$true] %s703_s4 }
  0x2d   : > { %s686_s29 = sshll.u32 %s3851_s13, 4  ;;  %s3856_s19 = sld [smem:[#allocation53_spill]]  ;;  %s687_s29 = int_to_ptr.hbm [resolvable:$true] %s686_s29 }
  0x2e   : > { %p3309_p6 = pnand %p2438_p5, %p97_p1  ;;  %s3107_s22 = smov [#allocation12]  }
  0x2f   : > { %s701_s6 = sshll.u32 %s3853_s15, 4  ;;  %s729_s14 = sshll.u32 %s3107_s22, 4  ;;  %s702_s6 = int_to_ptr.hbm [resolvable:$true] %s701_s6  ;;  %s730_s14 = int_to_ptr.vmem [resolvable:$true] %s729_s14 }
  0x30   : > { %2441 = dma.hbm_to_vmem [thread:$0]  (!%p3309_p6), %s687_s29, 16, %s689_s2, [#allocation7]  }
  0x31   : > { %s727_s26 = sshll.u32 %s3855_s17, 4  ;;  %s3108_s8 = smov [#allocation15]   ;;  %s728_s26 = int_to_ptr.hbm [resolvable:$true] %s727_s26 }
  0x32   : > { %2444 = dma.hbm_to_vmem [thread:$0]  (!%p3309_p6), %s702_s6, 16, %s704_s4, [#allocation10]  }
  0x33   : > { %s751_s15 = sshll.u32 %s3856_s19, 4  ;;  %s753_s13 = sshll.u32 %s3108_s8, 4  ;;  %s752_s15 = int_to_ptr.hbm [resolvable:$true] %s751_s15  ;;  %s754_s13 = int_to_ptr.vmem [resolvable:$true] %s753_s13 }
  0x34   : > { %2450 = dma.hbm_to_vmem [thread:$0]  (!%p3309_p6), %s728_s26, 16, %s730_s14, [#allocation13]  }
  0x35   : > { %s3857_s21 = sld [smem:[#allocation55_spill]]  ;;  %s3109_s22 = smov [#allocation18]  }
  0x36   : > { %2456 = dma.hbm_to_vmem [thread:$0]  (!%p3309_p6), %s752_s15, 16, %s754_s13, [#allocation16]  }
  0x37   : > { %s3858_s24 = sld [smem:[#allocation58_spill]]  ;;  %s779_s5 = sshll.u32 %s3109_s22, 4  ;;  %s780_s5 = int_to_ptr.vmem [resolvable:$true] %s779_s5 }
  0x38   : > { %s3110_s14 = smov [#allocation21]   ;;  %s3859_s16 = sld [smem:[#allocation50_spill]] }
  0x39   : > { %s806_s26 = sshll.u32 %s3110_s14, 4  ;;  %s3111_s15 = smov [#allocation11]   ;;  %s807_s26 = int_to_ptr.vmem [resolvable:$true] %s806_s26 }
  0x3a   : > { %s714_s13 = sshll.u32 %s3111_s15, 4  ;;  %s3860_s18 = sld [smem:[#allocation52_spill]]  ;;  %s715_s13 = int_to_ptr.vmem [resolvable:$true] %s714_s13 }
  0x3b   : > { %s777_s29 = sshll.u32 %s3857_s21, 4  ;;  %s3113_s22 = smov 8   ;;  %s778_s29 = int_to_ptr.hbm [resolvable:$true] %s777_s29 }
  0x3c   : > { %2462 = dma.hbm_to_vmem [thread:$0]  (!%p3309_p6), %s778_s29, 16, %s780_s5, [#allocation19]  }
  0x3d   : > { %s804_s4 = sshll.u32 %s3858_s24, 4  ;;  %s3112_s29 = smov 128   ;;  %s805_s4 = int_to_ptr.hbm [resolvable:$true] %s804_s4 }
  0x3e   : > { %s712_s8 = sshll.u32 %s3859_s16, 4  ;;  %s3114_s5 = smov [#allocation14]   ;;  %s713_s8 = int_to_ptr.hbm [resolvable:$true] %s712_s8 }
  0x3f   : > { %2468 = dma.hbm_to_vmem [thread:$0]  (!%p3309_p6), %s805_s4, 16, %s807_s26, [#allocation22]  }
  0x40   : > { %s739_s6 = sshll.u32 %s3860_s18, 4  ;;  %s741_s14 = sshll.u32 %s3114_s5, 4  ;;  %s740_s6 = int_to_ptr.hbm [resolvable:$true] %s739_s6  ;;  %s742_s14 = int_to_ptr.vmem [resolvable:$true] %s741_s14 }
  0x41   : > { %2447 = dma.hbm_to_vmem [thread:$0]  (!%p3309_p6), %s713_s8, 512, %s715_s13, [#allocation10], %s3112_s29, %s3112_s29, %s3113_s22  }
  0x42   : > { %s3861_s20 = sld [smem:[#allocation54_spill]]  ;;  %s3115_s2 = smov [#allocation17]  }
  0x43   : > { %2453 = dma.hbm_to_vmem [thread:$0]  (!%p3309_p6), %s740_s6, 16, %s742_s14, [#allocation13]  }
  0x44   : > { %s3862_s23 = sld [smem:[#allocation57_spill]]  ;;  %s764_s8 = sshll.u32 %s3115_s2, 4  ;;  %s765_s8 = int_to_ptr.vmem [resolvable:$true] %s764_s8 }
  0x45   : > { %s3116_s13 = smov [#allocation20]   ;;  %s3863_s25 = sld [smem:[#allocation59_spill]] }
  0x46   : > { %s794_s6 = sshll.u32 %s3116_s13, 4  ;;  %s3117_s10 = smov [#allocation23]   ;;  %s795_s6 = int_to_ptr.vmem [resolvable:$true] %s794_s6 }
  0x47   : > { %s818_s26 = sshll.u32 %s3117_s10, 4  ;;  %p90_p7 = scmp.ne.s32.totalorder %s3099_s7, %s3095_s3  ;;  %s819_s26 = int_to_ptr.vmem [resolvable:$true] %s818_s26 }
  0x48   : > { %s762_s4 = sshll.u32 %s3861_s20, 4  ;;  %p91_p9 = scmp.eq.s32.totalorder %s3103_s28, 0  ;;  %s763_s4 = int_to_ptr.hbm [resolvable:$true] %s762_s4 }
  0x49   : > { %2459 = dma.hbm_to_vmem [thread:$0]  (!%p3309_p6), %s763_s4, 512, %s765_s8, [#allocation16], %s3112_s29, %s3112_s29, %s3113_s22  }
  0x4a   : > { %s792_s30 = sshll.u32 %s3862_s23, 4  ;;  %s2319_s29 = sadd.s32 4294967294, %s3103_s28   ;;  %s793_s30 = int_to_ptr.hbm [resolvable:$true] %s792_s30 }
  0x4b   : > { %s816_s17 = sshll.u32 %s3863_s25, 4  ;;  %s3364_s22 = sadd.s32 1, %s3103_s28   ;;  %s817_s17 = int_to_ptr.hbm [resolvable:$true] %s816_s17 }
  0x4c   : > { %2465 = dma.hbm_to_vmem [thread:$0]  (!%p3309_p6), %s793_s30, 16, %s795_s6, [#allocation19]  }
  0x4d   : > { %2471 = dma.hbm_to_vmem [thread:$0]  (!%p3309_p6), %s817_s17, 16, %s819_s26, [#allocation22]  }
  0x4e   : > { %s83_s4 = sadd.s32 1, %s3099_s7  ;;  %s80_s15 = ssub.s32 %s3103_s28, %s3364_s22 }
  0x4f   : > { %p81_p8 = scmp.eq.s32.totalorder %s80_s15, 0  ;;  %p96_p10 = scmp.ne.s32.totalorder %s3095_s3, %s3091_s27 }
  0x50   : > { %p634_p11 = scmp.eq.s32.totalorder %s3292_s0, 1  ;;  %p3378_p12 = por %p91_p9, %p90_p7 }
  0x51   : > { %s3376_s30 = scalar_select %p81_p8, %s3099_s7, %s83_s4  }
  0x52   : > { %p3384_p13 = por %p97_p1, %p96_p10  ;;  %p3388_p0 = por %p634_p11, %p90_p7 }
  0x53   : > { %3864 = sst [smem:[#allocation35_spill]] %s3376_s30  ;;  %p640_p2 = scmp.eq.s32.totalorder %s2319_s29, 1 }
  0x54   : > { %p2494_p5 = scmp.lt.s32.totalorder %s3103_s28, 2  ;;  %s836_s13 = sand.u32 1, %s3099_s7  }
  0x55   : > { %p3394_p6 = por %p640_p2, %p96_p10  ;;  %s2333_s5 = sshll.u32 %s836_s13, 3 }
  0x56   : > { %s2334_s14 = sshll.u32 %s3103_s28, 3  ;;  %s3869_s26 = sld [smem:[#allocation37_spill]] }
  0x57   : > { %s840_s16 = scalar_lea.vmem [#allocation3], %s2333_s5  ;;  %p3404_p7 = pnand %p2494_p5, %p3378_p12 }
  0x58   : > { %s848_s18 = sshll.u32 %s840_s16, 4  ;;  %s3871_s21 = sld [smem:[#allocation38_spill]]  ;;  %s849_s18 = int_to_ptr.vmem [resolvable:$true] %s848_s18 }
  0x59   : > { %s855_s24 = sand.u32 1, %s3103_s28   ;;  %s837_s25 = scalar_lea.sflag [#allocation4], %s836_s13 }
  0x5a   : > { %p2953_p9 = pneg %p3404_p7 }
  0x5c   : > { %s844_s4 = scalar_lea.hbm %s3869_s26, %s2334_s14 }
  0x5d   : > { %s846_s15 = sshll.u32 %s844_s4, 4  ;;  %s2956_s4 = scalar_lea.hbm %s3869_s26, 16  ;;  %s847_s15 = int_to_ptr.hbm [resolvable:$true] %s846_s15 }
  0x5e   : > { %s863_s23 = scalar_lea.hbm %s3871_s21, %s2334_s14  ;;  %s2949_s17 = sshra.s32 %s847_s15, 4  ;;  %s2950_s17 = int_to_ptr.hbm [resolvable:$true] %s2949_s17 }
  0x5f   : > { %s2951_s10 = scalar_lea.hbm %s2950_s17, 8  ;;  %p2957_p12 = scmp.lt.s32.totalorder %s2950_s17, %s3869_s26 }
  0x60   : > { %p2952_p8 = scmp.ne.s32.totalorder %s2950_s17, %s2951_s10  ;;  %p2958_p2 = scmp.lt.s32.totalorder %s2956_s4, %s2951_s10 }
  0x62   : > { %p2954_p10 = pnand %p2953_p9, %p2952_p8  ;;  %p2959_p5 = por %p2958_p2, %p2957_p12 }
  0x64   : > { %p2955_p11 = pneg %p2954_p10 }
  0x66   : > { %p2960_p4 = pnand %p2959_p5, %p2955_p11 }
  0x68   : > { %2963 = shalt.err (!%p2960_p4)
}
  0x69   : > { %2475 = dma.hbm_to_vmem [thread:$0]  (!%p3404_p7), %s847_s15, 128, %s849_s18, %s837_s25  }
  0x6a   : > { %s865_s13 = sshll.u32 %s863_s23, 4  ;;  %s859_s14 = scalar_lea.vmem [#allocation6], %s2333_s5  ;;  %s866_s13 = int_to_ptr.hbm [resolvable:$true] %s865_s13 }
  0x6b   : > { %s867_s30 = sshll.u32 %s859_s14, 4  ;;  %s856_s7 = scalar_lea.sflag [#allocation7], %s855_s24  ;;  %s868_s30 = int_to_ptr.vmem [resolvable:$true] %s867_s30 }
  0x6c   : > { %s2979_s16 = sshra.s32 %s866_s13, 4  ;;  %s2986_s4 = scalar_lea.hbm %s3871_s21, 16  ;;  %s2980_s16 = int_to_ptr.hbm [resolvable:$true] %s2979_s16 }
  0x6d   : > { %s2981_s2 = scalar_lea.hbm %s2980_s16, 8  ;;  %p2987_p4 = scmp.lt.s32.totalorder %s2980_s16, %s3871_s21 }
  0x6e   : > { %p2982_p8 = scmp.ne.s32.totalorder %s2980_s16, %s2981_s2  ;;  %p2988_p11 = scmp.lt.s32.totalorder %s2986_s4, %s2981_s2 }
  0x70   : > { %p2984_p10 = pnand %p2982_p8, %p2953_p9  ;;  %p2989_p2 = por %p2988_p11, %p2987_p4 }
  0x72   : > { %p2985_p12 = pneg %p2984_p10 }
  0x74   : > { %p2990_p5 = pnand %p2989_p2, %p2985_p12 }
  0x76   : > { %2993 = shalt.err (!%p2990_p5)
}
  0x77   : > { %2478 = dma.hbm_to_vmem [thread:$0]  (!%p3404_p7), %s866_s13, 128, %s868_s30, %s856_s7  }
  0x78   : > { %882 = sbr.rel (%p3297_p3) target bundleno = 3354 (0xd1a), region = 124  ;;  %s3439_s23 = sand.u32 (!%p3297_p3), 1, %s3095_s3  }
  0x79   : > { %s3442_s24 = sshll.u32 (!%p3297_p3), %s3439_s23, 3  ;;  %s885_s25 = scalar_lea.sflag (!%p3297_p3), [#allocation4], %s3439_s23 }
  0x7a   : > { %s888_s5 = scalar_lea.vmem (!%p3297_p3), [#allocation3], %s3442_s24 }
  0x7d   : > { %3054 = dma.done.wait (%p3384_p13), %s885_s25, 128  }
  0x7e   : > { %3056 = vsyncadd (%p3384_p13), %s885_s25, 4294967168  ;;  %s894_s7 = sand.u32 1, %s3292_s0   ;;  %s898_s30 = scalar_lea.vmem [#allocation6], %s3442_s24 }
  0x7f   : > { %s895_s9 = scalar_lea.sflag [#allocation7], %s894_s7 }
  0x80   : > { %3058 = dma.done.wait (%p3384_p13), %s895_s9, 128  }
  0x81   : > { %3060 = vsyncadd (%p3384_p13), %s895_s9, 4294967168 }
  0x82   : > { %3062 = dma.done.wait (%p97_p1), [#allocation7], 16  }
  0x83   : > { %3064 = vsyncadd (%p97_p1), [#allocation7], 4294967280 }
  0x84   : > { %3066 = dma.done.wait (%p97_p1), [#allocation10], 528  }
  0x85   : > { %3068 = vsyncadd (%p97_p1), [#allocation10], 4294966768 }
  0x86   : > { %3070 = dma.done.wait (%p97_p1), [#allocation13], 32  }
  0x87   : > { %3072 = vsyncadd (%p97_p1), [#allocation13], 4294967264 }
  0x88   : > { %3074 = dma.done.wait (%p97_p1), [#allocation16], 528  }
  0x89   : > { %3076 = vsyncadd (%p97_p1), [#allocation16], 4294966768 }
  0x8a   : > { %3078 = dma.done.wait (%p97_p1), [#allocation19], 32  }
  0x8b   : > { %3080 = vsyncadd (%p97_p1), [#allocation19], 4294967264 }
  0x8c   : > { %3082 = dma.done.wait (%p97_p1), [#allocation22], 32  }
  0x8d   : > { %3084 = vsyncadd (%p97_p1), [#allocation22], 4294967264  ;;  %p1035_p3 = scmp.lt.s32.totalorder %s3292_s0, 1  ;;  %s3872_s13 = sld [smem:[#allocation40_spill]]  ;;  %vm1053_vm0 = vcmask 261120   ;;  %vm1085_vm1 = vcmask 64512   ;;  %v1077_v15 = vlaneseq }
  0x8e   : > { %s3873_s10 = sld [smem:[#allocation36_spill]]  ;;  %s3118_s20 = smov 88  }
  0x8f   : > { %s3482_s1 = scalar_select %p1035_p3, %s3292_s0, 1  ;;  %v1078_v16 = vshrl.u32 %v1077_v15, 7  ;;  %v1080_v17 = vand.u32 127, %v1077_v15 }
  0x90   : > { %s3874_s29 = sld [smem:[#allocation41_spill]]  ;;  %s3119_s14 = smov 64  }
  0x91   : > { %s2352_s15 = sshll.u32 %s3482_s1, 3  ;;  %s3120_s16 = smov 96   ;;  %vm1081_vm2 = vcmp.ge.s32.totalorder %v1078_v16, %v1080_v17 }
  0x92   : > { %s3121_s2 = smov 120   ;;  %s3122_s17 = smov 80  }
  0x93   : > { %v1048_v0 = vld [vmem:[%s3872_s13 + $0x18] sm:$0xff]  ;;  %v1047_v1 = vld [vmem:[%s3872_s13 + $0x10] sm:$0xff]  ;;  %v1046_v2 = vld [vmem:[%s3872_s13 + $0x8] sm:$0xff]  ;;  %s3125_s19 = smov 104   ;;  %s3126_s18 = smov 40  }
  0x94   : > { %s1038_s4 = scalar_lea.vmem %s3873_s10, %s2352_s15  ;;  %1069 = vmatpush.msra.mxu2 %v1048_v0  ;;  %v1045_v3 = vld [vmem:[%s3872_s13] sm:$0xff]  ;;  %s3123_s10 = smov 72  }
  0x95   : > { %v3500_v4 = vld [vmem:[%s1038_s4] sm:$0xff]  ;;  %s3124_s4 = smov 112   ;;  %s3127_s25 = smov 56  }
  0x96   : > { %1070 = vmatpush.msra.mxu2 %v1047_v1  ;;  %v2567_v5 = vld [vmem:[%s3874_s29] ss:$0 sm:$0xff]  ;;  %s3128_s7 = smov 48   ;;  %s3129_s9 = smov 8  }
  0x97   : > { %s3823_s15 = smov 16   ;;  %s3824_s29 = smov 24  }
  0x98   : > { %1071 = vmatpush.msra.mxu2 %v1046_v2 }
  0x9a   : > { %1072 = vmatpush.msra.mxu2 %v1045_v3 }
  0x9b   : > { %2353 = vmatmul.msk.f32.vlgmr.msra.gmra.mxu2 %vm1053_vm0, %v3500_v4 }
 0x11e   : > { %v1074_v6 = vpop.f32.mrf.mxu2 }
 0x11f   : > { %v3507_v7 = vadd.f32 %v2567_v5, %v1074_v6 }
 0x121   : > { %1164 = vrot.lane.b32.xlu2 %v3507_v7, %s3118_s20  ;;  %1135 = vrot.lane.b32.xlu1 %v3507_v7, %s3119_s14  ;;  %s3880_s14 = sld [smem:[#allocation39_spill]] }
 0x122   : > { %1083 = vrot.lane.b32.xlu0 %v3507_v7, %s3120_s16  ;;  %s3875_s16 = sld [smem:[#allocation42_spill]] }
 0x129   : > { %1162 = vrot.lane.b32.xlu2 %v3507_v7, %s3121_s2 }
 0x131   : > { %1249 = vrot.lane.b32.xlu2 %v3507_v7, %s3122_s17  ;;  %s3878_s17 = sld [smem:[#allocation44_spill]] }
 0x139   : > { %1334 = vrot.lane.b32.xlu2 %v3507_v7, %s3123_s10  ;;  %s3877_s10 = sld [smem:[#allocation46_spill]] }
 0x141   : > { %1247 = vrot.lane.b32.xlu2 %v3507_v7, %s3124_s4 }
 0x17b   : > { %v1165_v8 = vpop.permute.xlu2 %1164 }
 0x183   : > { %v1163_v9 = vpop.permute.xlu2 %1162 }
 0x18b   : > { %v1250_v10 = vpop.permute.xlu2 %1249 }
 0x193   : > { %v1335_v11 = vpop.permute.xlu2 %1334  ;;  %v1136_v12 = vpop.permute.xlu1 %1135 }
 0x194   : > { %v1084_v13 = vpop.permute.xlu0 %1083  ;;  %1156 = vmatpush.msra.mxu3 %v1136_v12  ;;  %2363 = vmatpush.xpose.msk.msra.mxu0 %vm1085_vm1, %v1335_v11 }
 0x195   : > { %2354 = vmatpush.xpose.msk.msra.mxu1 %vm1085_vm1, %v1084_v13 }
 0x196   : > { %2357 = vmatpush.xpose.msk.msrb.mxu3 %vm1085_vm1, %v1165_v8 }
 0x198   : > { %2355 = vmatmul.msk.f32.vlgmr.msra.gmra.mxu1 %vm1085_vm1, %v3507_v7 }
 0x199   : > { %2360 = vmatpush.xpose.msk.msrb.mxu1 %vm1085_vm1, %v1250_v10 }
 0x19b   : > { %v1248_v14 = vpop.permute.xlu2 %1247 }
 0x1a0   : > { %2361 = vmatmul.msk.f32.vlgmr.msrb.gmra.mxu1 %vm1085_vm1, %v1248_v14 }
 0x215   : > { %v1107_v18 = vpop.f32.mrf.mxu1 }
 0x216   : > { %v1110_v19 = vsel %vm1081_vm2, %v1107_v18, -1e-30 }
 0x217   : > { %v1111_v20 = vsel %vm1085_vm1, %v1110_v19, -inf }
 0x218   : > { %1112 = vmax.xlane.f32.xlu0 %v1111_v20 }
 0x21d   : > { %v1272_v26 = vpop.f32.mrf.mxu1 }
 0x21e   : > { %v1275_v27 = vsel %vm1081_vm2, %v1272_v26, -1e-30 }
 0x21f   : > { %v1276_v28 = vsel %vm1085_vm1, %v1275_v27, -inf }
 0x28b   : > { %v1113_v21 = vpop.xlane.xlu0 %1112 }
 0x28c   : > { %v1114_v22 = vsub.f32 %v1110_v19, %v1113_v21 }
 0x28e   : > { %v1115_v23 = vmul.f32 1.442695, %v1114_v22 }
 0x290   : > { %2581 = vpow2.f32 %v1115_v23 }
 0x296   : > { %v2582_v24 = vpop.eup %2581 }
 0x297   : > { %v1117_v25 = vsel %vm1085_vm1, %v2582_v24, 0.0 }
 0x298   : > { %1118 = vadd.xlane.f32.xlu1 %v1117_v25 }
 0x2b1   : > { %1332 = vrot.lane.b32.xlu1 %v3507_v7, %s3125_s19 }
 0x2db   : > { %1277 = vmax.xlane.f32.xlu1 %v1276_v28 }
 0x2f4   : > { %1385 = vrot.lane.b32.xlu1 %v3507_v7, %s3126_s18  ;;  %s3883_s18 = sld [smem:[#allocation48_spill]] }
 0x30b   : > { %v1119_v29 = vpop.xlane.xlu1 %1118 }
 0x30c   : > { %2583 = vrcp.f32 %v1119_v29  ;;  %v1131_v33 = vand.u32 2147483648, %v1119_v29  ;;  %v1129_v35 = vand.u32 2147483647, %v1119_v29  ;;  %vm1125_vm4 = vweird.f32 %v1119_v29 }
 0x30e   : > { %v1132_v37 = vor.u32 1.1754944e-38, %v1131_v33  ;;  %vm1130_vm6 = vcmp.eq.f32.partialorder %v1129_v35, 8.507059e+37 }
 0x312   : > { %v2584_v30 = vpop.eup %2583 }
 0x313   : > { %v1121_v31 = vmul.f32 %v2584_v30, %v1119_v29  ;;  %vm1126_vm3 = vweird.f32 %v2584_v30 }
 0x314   : > { %vm1127_vm5 = vmor %vm1125_vm4, %vm1126_vm3 }
 0x315   : > { %v1122_v32 = vsub.f32 1.0, %v1121_v31 }
 0x317   : > { %v1123_v34 = vmul.f32 %v2584_v30, %v1122_v32 }
 0x319   : > { %v1124_v36 = vadd.f32 %v2584_v30, %v1123_v34 }
 0x31b   : > { %v1128_v38 = vsel %vm1127_vm5, %v2584_v30, %v1124_v36  ;;  %vm1245_vm5 = vcmask 130112  }
 0x31c   : > { %v1133_v39 = vsel %vm1130_vm6, %v1132_v37, %v1128_v38  ;;  %vm1330_vm6 = vcmask 195712  }
 0x31d   : > { %v1134_v40 = vmul.f32 %v2582_v24, %v1133_v39 }
 0x31f   : > { %2356 = vmatmul.msk.f32.vlgmr.msra.gmra.mxu3 %vm1085_vm1, %v1134_v40 }
 0x323   : > { %v1333_v41 = vpop.permute.xlu1 %1332 }
 0x324   : > { %2364 = vmatmul.msk.f32.vlgmr.msra.gmra.mxu0 %vm1085_vm1, %v1333_v41 }
 0x327   : > { %2358 = vmatmul.msk.f32.vlgmr.msrb.gmra.mxu3 %vm1085_vm1, %v1163_v9 }
 0x34e   : > { %v1278_v42 = vpop.xlane.xlu1 %1277 }
 0x34f   : > { %v1279_v43 = vsub.f32 %v1275_v27, %v1278_v42 }
 0x351   : > { %v1280_v44 = vmul.f32 1.442695, %v1279_v43  ;;  %v1421_v43 = vld [vmem:[%s3875_s16 + $0x18] sm:$0xff] }
 0x352   : > { %1441 = vmatpush.msra.mxu1 %v1421_v43  ;;  %v1549_v43 = vld [vmem:[%s3883_s18 + $0x18] sm:$0xff] }
 0x353   : > { %2585 = vpow2.f32 %v1280_v44  ;;  %v1420_v44 = vld [vmem:[%s3875_s16 + $0x10] sm:$0xff] }
 0x354   : > { %1442 = vmatpush.msra.mxu1 %v1420_v44  ;;  %v1548_v44 = vld [vmem:[%s3883_s18 + $0x10] sm:$0xff] }
 0x359   : > { %v3539_v49 = vpop.eup %2585 }
 0x35a   : > { %v1282_v52 = vsel %vm1085_vm1, %v3539_v49, 0.0 }
 0x366   : > { %v1386_v63 = vpop.permute.xlu1 %1385 }
 0x3a1   : > { %v1357_v45 = vpop.f32.mrf.mxu0 }
 0x3a2   : > { %v1360_v46 = vsel %vm1081_vm2, %v1357_v45, -1e-30  ;;  %v1158_v47 = vpop.f32.mrf.mxu3  ;;  %v1419_v45 = vld [vmem:[%s3875_s16 + $0x8] sm:$0xff] }
 0x3a3   : > { %1161 = vst.msk [vmem:[#allocation2] sm:$0xff] %vm1085_vm1, %v1158_v47  ;;  %v1361_v48 = vsel %vm1085_vm1, %v1360_v46, -inf  ;;  %1443 = vmatpush.msra.mxu1 %v1419_v45  ;;  %v1547_v45 = vld [vmem:[%s3883_s18 + $0x8] sm:$0xff] }
 0x3a4   : > { %1362 = vmax.xlane.f32.xlu0 %v1361_v48 }
 0x3aa   : > { %v1187_v50 = vpop.f32.mrf.mxu3 }
 0x3ab   : > { %v1190_v51 = vsel %vm1081_vm2, %v1187_v50, -1e-30 }
 0x3ac   : > { %1283 = vadd.xlane.f32.xlu0 %v1282_v52  ;;  %v1191_v53 = vsel %vm1085_vm1, %v1190_v51, -inf  ;;  %v1517_v52 = vld [vmem:[%s3799_s12 + $0x10] sm:$0xff] }
 0x3ad   : > { %1192 = vmax.xlane.f32.xlu2 %v1191_v53  ;;  %v1516_v53 = vld [vmem:[%s3799_s12 + $0x8] sm:$0xff] }
 0x3c5   : > { %1215 = vrot.lane.b32.xlu2 %v3507_v7, %s3127_s25  ;;  %s3879_s25 = sld [smem:[#allocation45_spill]] }
 0x417   : > { %v1363_v54 = vpop.xlane.xlu0 %1362 }
 0x418   : > { %v1364_v55 = vsub.f32 %v1360_v46, %v1363_v54  ;;  %v1418_v46 = vld [vmem:[%s3875_s16] sm:$0xff] }
 0x419   : > { %1444 = vmatpush.msra.mxu1 %v1418_v46  ;;  %v1515_v54 = vld [vmem:[%s3799_s12] sm:$0xff] }
 0x41a   : > { %v1365_v56 = vmul.f32 1.442695, %v1364_v55  ;;  %v1546_v46 = vld [vmem:[%s3883_s18] sm:$0xff] }
 0x41c   : > { %2587 = vpow2.f32 %v1365_v56 }
 0x41f   : > { %v1284_v2 = vpop.xlane.xlu0 %1283 }
 0x420   : > { %v1193_v57 = vpop.xlane.xlu2 %1192  ;;  %vm1290_vm8 = vweird.f32 %v1284_v2  ;;  %v1296_v17 = vand.u32 2147483648, %v1284_v2 }
 0x421   : > { %v1194_v58 = vsub.f32 %v1190_v51, %v1193_v57  ;;  %v1518_v51 = vld [vmem:[%s3799_s12 + $0x18] sm:$0xff] }
 0x422   : > { %v3546_v59 = vpop.eup %2587  ;;  %v1297_v24 = vor.u32 1.1754944e-38, %v1296_v17  ;;  %1538 = vmatpush.msrb.mxu1 %v1518_v51 }
 0x423   : > { %v1195_v60 = vmul.f32 1.442695, %v1194_v58  ;;  %v1367_v61 = vsel %vm1085_vm1, %v3546_v59, 0.0 }
 0x424   : > { %1368 = vadd.xlane.f32.xlu0 %v1367_v61  ;;  %1539 = vmatpush.msrb.mxu1 %v1517_v52  ;;  %v1043_v61 = vld [vmem:[%s888_s5] sm:$0xff]  ;;  %s3887_s5 = sld [smem:[#allocation60_spill]] }
 0x425   : > { %2589 = vpow2.f32 %v1195_v60 }
 0x426   : > { %2591 = vrcp.f32 %v1284_v2  ;;  %1540 = vmatpush.msrb.mxu1 %v1516_v53 }
 0x428   : > { %v1216_v62 = vpop.permute.xlu2 %1215  ;;  %1541 = vmatpush.msrb.mxu1 %v1515_v54 }
 0x429   : > { %1236 = vmatpush.msrb.mxu2 %v1216_v62  ;;  %v1487_v62 = vld [vmem:[%s3877_s10 + $0x18] sm:$0xff] }
 0x42b   : > { %1406 = vmatpush.msra.mxu2 %v1386_v63  ;;  %v2590_v0 = vpop.eup %2589  ;;  %v1486_v63 = vld [vmem:[%s3877_s10 + $0x10] sm:$0xff] }
 0x42c   : > { %v1197_v1 = vsel %vm1085_vm1, %v2590_v0, 0.0  ;;  %v2592_v5 = vpop.eup %2591 }
 0x42d   : > { %1198 = vadd.xlane.f32.xlu0 %v1197_v1  ;;  %v1286_v6 = vmul.f32 %v2592_v5, %v1284_v2  ;;  %vm1291_vm7 = vweird.f32 %v2592_v5 }
 0x42e   : > { %vm1292_vm9 = vmor %vm1290_vm8, %vm1291_vm7  ;;  %vm1415_vm7 = vcmask 261312  }
 0x42f   : > { %v1287_v8 = vsub.f32 1.0, %v1286_v6 }
 0x431   : > { %v1288_v11 = vmul.f32 %v2592_v5, %v1287_v8 }
 0x433   : > { %v1289_v14 = vadd.f32 %v2592_v5, %v1288_v11 }
 0x435   : > { %v1293_v19 = vsel %vm1292_vm9, %v2592_v5, %v1289_v14 }
 0x441   : > { %1300 = vrot.lane.b32.xlu0 %v3507_v7, %s3128_s7  ;;  %v1294_v7 = vand.u32 2147483647, %v1284_v2  ;;  %v1484_v2 = vld [vmem:[%s3877_s10] sm:$0xff]  ;;  %s2385_s7 = sshll.u32 %s3292_s0, 3  ;;  %s2086_s0 = scalar_lea.sflag [#allocation5], %s3439_s23 }
 0x443   : > { %vm1295_vm11 = vcmp.eq.f32.partialorder %v1294_v7, 8.507059e+37  ;;  %v2569_v7 = vld [vmem:[%s3878_s17] ss:$0 sm:$0xff]  ;;  %s1041_s17 = scalar_lea.vmem %s3880_s14, %s3482_s1  ;;  %s2096_s14 = scalar_lea.hbm %s3887_s5, %s2385_s7 }
 0x444   : > { %v1298_v26 = vsel %vm1295_vm11, %v1297_v24, %v1293_v19  ;;  %v2571_v24 = vld [vmem:[#allocation8] ss:$0 sm:$0xff] }
 0x445   : > { %v1299_v35 = vmul.f32 %v3539_v49, %v1298_v26 }
 0x497   : > { %v1369_v3 = vpop.xlane.xlu0 %1368 }
 0x498   : > { %2593 = vrcp.f32 %v1369_v3  ;;  %v1381_v30 = vand.u32 2147483648, %v1369_v3  ;;  %vm1375_vm2 = vweird.f32 %v1369_v3  ;;  %v1379_v32 = vand.u32 2147483647, %v1369_v3 }
 0x49a   : > { %v1382_v37 = vor.u32 1.1754944e-38, %v1381_v30  ;;  %vm1380_vm4 = vcmp.eq.f32.partialorder %v1379_v32, 8.507059e+37  ;;  %v1577_v32 = vld [vmem:[%s1041_s17] sm:$0x1] }
 0x49b   : > { %vm1578_vm11 = vcmp.ne.s32.totalorder %v1577_v32, 0 }
 0x49e   : > { %v2594_v10 = vpop.eup %2593 }
 0x49f   : > { %v1371_v12 = vmul.f32 %v2594_v10, %v1369_v3  ;;  %vm1376_vm14 = vweird.f32 %v2594_v10 }
 0x4a0   : > { %v1199_v9 = vpop.xlane.xlu0 %1198  ;;  %vm1377_vm3 = vmor %vm1375_vm2, %vm1376_vm14 }
 0x4a1   : > { %2595 = vrcp.f32 %v1199_v9  ;;  %v1372_v15 = vsub.f32 1.0, %v1371_v12  ;;  %v1211_v20 = vand.u32 2147483648, %v1199_v9  ;;  %v1209_v23 = vand.u32 2147483647, %v1199_v9 }
 0x4a2   : > { %vm1205_vm12 = vweird.f32 %v1199_v9 }
 0x4a3   : > { %v1373_v21 = vmul.f32 %v2594_v10, %v1372_v15  ;;  %v1212_v27 = vor.u32 1.1754944e-38, %v1211_v20  ;;  %vm1210_vm15 = vcmp.eq.f32.partialorder %v1209_v23, 8.507059e+37  ;;  %v2570_v20 = vld [vmem:[%s3879_s25] ss:$0 sm:$0xff] }
 0x4a5   : > { %v1374_v28 = vadd.f32 %v2594_v10, %v1373_v21 }
 0x4a7   : > { %v2596_v13 = vpop.eup %2595  ;;  %v1378_v36 = vsel %vm1377_vm3, %v2594_v10, %v1374_v28 }
 0x4a8   : > { %v1201_v16 = vmul.f32 %v2596_v13, %v1199_v9  ;;  %vm1206_vm10 = vweird.f32 %v2596_v13  ;;  %v1383_v38 = vsel %vm1380_vm4, %v1382_v37, %v1378_v36 }
 0x4a9   : > { %vm1207_vm13 = vmor %vm1205_vm12, %vm1206_vm10  ;;  %v1384_v39 = vmul.f32 %v3546_v59, %v1383_v38 }
 0x4aa   : > { %v1202_v18 = vsub.f32 1.0, %v1201_v16 }
 0x4ac   : > { %v1203_v22 = vmul.f32 %v2596_v13, %v1202_v18 }
 0x4ae   : > { %v1204_v25 = vadd.f32 %v2596_v13, %v1203_v22 }
 0x4b0   : > { %v1208_v29 = vsel %vm1207_vm13, %v2596_v13, %v1204_v25 }
 0x4b1   : > { %v1213_v31 = vsel %vm1210_vm15, %v1212_v27, %v1208_v29 }
 0x4b2   : > { %v1214_v33 = vmul.f32 %v2590_v0, %v1213_v31  ;;  %v1485_v0 = vld [vmem:[%s3877_s10 + $0x8] sm:$0xff] }
 0x4b3   : > { %v1301_v34 = vpop.permute.xlu0 %1300 }
 0x4b4   : > { %2359 = vmatmul.msk.f32.vlgmr.msrb.gmra.mxu2 %vm1085_vm1, %v1214_v33  ;;  %1321 = vmatpush.msra.mxu3 %v1301_v34  ;;  %v3132_v34 = vmov 0  }
 0x4b5   : > { %2362 = vmatmul.msk.f32.vlgmr.msra.gmra.mxu3 %vm1085_vm1, %v1299_v35  ;;  %v1605_v35 = vsel %vm1578_vm11, 1, %v3132_v34  ;;  %1569 = vmatpush.msrb.mxu2 %v1549_v43 }
 0x4b6   : > { %1507 = vmatpush.msrb.mxu3 %v1487_v62  ;;  %v1606_v36 = vperm.slane %v1605_v35, 0  ;;  %v2573_v62 = vld [vmem:[#allocation9] ss:$0 sm:$0xff] }
 0x4b7   : > { %1570 = vmatpush.msrb.mxu2 %v1548_v44 }
 0x4b8   : > { %1508 = vmatpush.msrb.mxu3 %v1486_v63  ;;  %vm3640_vm12 = vcmp.eq.s32.totalorder %v1606_v36, 1 }
 0x4b9   : > { %1571 = vmatpush.msrb.mxu2 %v1547_v45 }
 0x4ba   : > { %1509 = vmatpush.msrb.mxu3 %v1485_v0 }
 0x4bb   : > { %1572 = vmatpush.msrb.mxu2 %v1546_v46 }
 0x4bc   : > { %2365 = vmatmul.msk.f32.vlgmr.msra.gmra.mxu2 %vm1085_vm1, %v1384_v39  ;;  %1510 = vmatpush.msrb.mxu3 %v1484_v2 }
 0x537   : > { %v1238_v40 = vpop.f32.mrf.mxu2 }
 0x538   : > { %1242 = vrot.lane.b32.xlu0 %v1238_v40, %s3129_s9  ;;  %v1323_v41 = vpop.f32.mrf.mxu3 }
 0x539   : > { %1327 = vrot.lane.b32.xlu2 %v1323_v41, %s3823_s15  ;;  %s3876_s15 = sld [smem:[#allocation43_spill]] }
 0x53f   : > { %v1408_v42 = vpop.f32.mrf.mxu2  ;;  %v2568_v55 = vld [vmem:[%s3876_s15] ss:$0 sm:$0xff] }
 0x540   : > { %1412 = vrot.lane.b32.xlu1 %v1408_v42, %s3824_s29 }
 0x593   : > { %v1328_v48 = vpop.permute.xlu2 %1327 }
 0x5aa   : > { %v1243_v47 = vpop.permute.xlu0 %1242 }
 0x5ab   : > { %1246 = vst.msk [vmem:[#allocation2] sm:$0xff] %vm1245_vm5, %v1243_v47  ;;  %v1044_v47 = vld [vmem:[%s898_s30] sm:$0xff]  ;;  %s3884_s30 = smov 16  }
 0x5ac   : > { %1331 = vst.msk [vmem:[#allocation2] sm:$0xff] %vm1330_vm6, %v1328_v48  ;;  %2369 = vmatmul.msk.f32.vlgmr.msrb.gmra.mxu2 %vm1053_vm0, %v1044_v47 }
 0x5b2   : > { %v1413_v49 = vpop.permute.xlu1 %1412 }
 0x5b3   : > { %1416 = vst.msk [vmem:[#allocation2] sm:$0xff] %vm1415_vm7, %v1413_v49 }
 0x5ba   : > { %v1417_v50 = vld [vmem:[#allocation2] sm:$0xff] }
 0x5bb   : > { %2366 = vmatmul.msk.f32.vlgmr.msra.gmra.mxu1 %vm1053_vm0, %v1417_v50 }
 0x5c3   : > { %2368 = vmatmul.msk.f32.vlgmr.msrb.gmra.mxu1 %vm1053_vm0, %v1043_v61 }
 0x62f   : > { %v1574_v63 = vpop.f32.mrf.mxu2 }
 0x630   : > { %v1575_v0 = vadd.f32 %v2573_v62, %v1574_v63 }
 0x632   : > { %1651 = vmatpush.msra.mxu3 %v1575_v0 }
 0x638   : > { %v1446_v56 = vpop.f32.mrf.mxu1 }
 0x639   : > { %v1447_v57 = vadd.f32 %v2568_v55, %v1446_v56 }
 0x63b   : > { %v1449_v58 = vsel %vm1053_vm0, %v1447_v57, 0.0  ;;  %v1453_v59 = vmul.f32 %v1447_v57, %v1447_v57 }
 0x63c   : > { %1450 = vadd.xlane.f32.xlu0 %v1449_v58 }
 0x63d   : > { %v1454_v60 = vsel %vm1053_vm0, %v1453_v59, 0.0 }
 0x63e   : > { %1455 = vadd.xlane.f32.xlu2 %v1454_v60 }
 0x640   : > { %v1543_v25 = vpop.f32.mrf.mxu1 }
 0x641   : > { %v1544_v26 = vadd.f32 %v2571_v24, %v1543_v25 }
 0x643   : > { %1659 = vrot.lane.b32.xlu1 %v1544_v26, %s3121_s2  ;;  %2370 = vmatpush.xpose.msk.msra.mxu1 %vm1085_vm1, %v1544_v26 }
 0x64b   : > { %1744 = vrot.lane.b32.xlu1 %v1544_v26, %s3124_s4 }
 0x653   : > { %1828 = vrot.lane.b32.xlu1 %v1544_v26, %s3125_s19 }
 0x6af   : > { %v1451_v1 = vpop.xlane.xlu0 %1450 }
 0x6b0   : > { %v1452_v3 = vmul.f32 0.03125, %v1451_v1 }
 0x6b1   : > { %v1456_v5 = vpop.xlane.xlu2 %1455 }
 0x6b2   : > { %v1458_v6 = vmul.f32 %v1452_v3, %v1452_v3  ;;  %v1457_v8 = vmul.f32 0.03125, %v1456_v5  ;;  %v1460_v17 = vsub.f32 %v1447_v57, %v1452_v3 }
 0x6b4   : > { %v1459_v9 = vsub.f32 %v1457_v8, %v1458_v6 }
 0x6b5   : > { %v1660_v29 = vpop.permute.xlu1 %1659 }
 0x6b6   : > { %v1461_v10 = vadd.f32 1e-05, %v1459_v9  ;;  %2373 = vmatpush.xpose.msk.msrb.mxu0 %vm1085_vm1, %v1660_v29 }
 0x6b8   : > { %2597 = vrsqrt.f32 %v1461_v10  ;;  %vm1468_vm9 = vweird.f32 %v1461_v10 }
 0x6bd   : > { %v1745_v30 = vpop.permute.xlu1 %1744 }
 0x6be   : > { %v2598_v11 = vpop.eup %2597  ;;  %2376 = vmatpush.xpose.msk.msrb.mxu1 %vm1085_vm1, %v1745_v30 }
 0x6bf   : > { %v1463_v12 = vmul.f32 %v2598_v11, %v1461_v10  ;;  %vm1469_vm8 = vweird.f32 %v2598_v11 }
 0x6c0   : > { %vm1470_vm10 = vmor %vm1468_vm9, %vm1469_vm8 }
 0x6c1   : > { %v1464_v13 = vmul.f32 %v2598_v11, %v1463_v12 }
 0x6c3   : > { %v1465_v14 = vmul.f32 0.5, %v1464_v13 }
 0x6c5   : > { %v1466_v15 = vsub.f32 1.5, %v1465_v14  ;;  %v1829_v31 = vpop.permute.xlu1 %1828 }
 0x6c6   : > { %2379 = vmatpush.xpose.msk.msra.mxu0 %vm1085_vm1, %v1829_v31 }
 0x6c7   : > { %v1467_v16 = vmul.f32 %v2598_v11, %v1466_v15 }
 0x6c9   : > { %v1471_v18 = vsel %vm1470_vm10, %v2598_v11, %v1467_v16 }
 0x6ca   : > { %v1472_v19 = vmul.f32 %v1471_v18, %v1460_v17 }
 0x6cc   : > { %v1477_v21 = vmul.f32 %v2569_v7, %v1472_v19 }
 0x6ce   : > { %v1482_v22 = vadd.f32 %v2570_v20, %v1477_v21 }
 0x6d0   : > { %v3615_v23 = vadd.f32 %v1482_v22, %v3500_v4  ;;  %v2572_v4 = vld [vmem:[%s3798_s11] ss:$0 sm:$0xff] }
 0x6d2   : > { %2367 = vmatmul.msk.f32.vlgmr.msrb.gmra.mxu3 %vm1053_vm0, %v3615_v23 }
 0x755   : > { %v1512_v27 = vpop.f32.mrf.mxu3 }
 0x756   : > { %v1513_v28 = vadd.f32 %v2572_v4, %v1512_v27 }
 0x758   : > { %1826 = vrot.lane.b32.xlu0 %v1513_v28, %s3125_s19  ;;  %1657 = vrot.lane.b32.xlu1 %v1513_v28, %s3121_s2 }
 0x759   : > { %2371 = vmatmul.msk.f32.vlgmr.msra.gmra.mxu1 %vm1085_vm1, %v1513_v28 }
 0x760   : > { %1742 = vrot.lane.b32.xlu1 %v1513_v28, %s3124_s4 }
 0x7ca   : > { %v1658_v33 = vpop.permute.xlu1 %1657  ;;  %v1827_v37 = vpop.permute.xlu0 %1826 }
 0x7cb   : > { %2374 = vmatmul.msk.f32.vlgmr.msrb.gmra.mxu0 %vm1085_vm1, %v1658_v33 }
 0x7d2   : > { %v1743_v38 = vpop.permute.xlu1 %1742 }
 0x7d3   : > { %2377 = vmatmul.msk.f32.vlgmr.msrb.gmra.mxu1 %vm1085_vm1, %v1743_v38  ;;  %2380 = vmatmul.msk.f32.vlgmr.msra.gmra.mxu0 %vm1085_vm1, %v1827_v37 }
 0x7d6   : > { %v1602_v40 = vpop.f32.mrf.mxu1 }
 0x7d7   : > { %v1608_v41 = vsel %vm3640_vm12, %v1602_v40, -1e-30 }
 0x7d8   : > { %v1609_v42 = vsel %vm1085_vm1, %v1608_v41, -inf }
 0x7d9   : > { %1610 = vmax.xlane.f32.xlu2 %v1609_v42 }
 0x848   : > { %v1682_v48 = vpop.f32.mrf.mxu0 }
 0x849   : > { %v1685_v49 = vsel %vm3640_vm12, %v1682_v48, -1e-30 }
 0x84a   : > { %v1686_v50 = vsel %vm1085_vm1, %v1685_v49, -inf }
 0x84b   : > { %1687 = vmax.xlane.f32.xlu1 %v1686_v50 }
 0x84c   : > { %v1611_v51 = vpop.xlane.xlu2 %1610 }
 0x84d   : > { %v1612_v52 = vsub.f32 %v1608_v41, %v1611_v51 }
 0x84f   : > { %v1613_v53 = vmul.f32 1.442695, %v1612_v52 }
 0x850   : > { %v1767_v54 = vpop.f32.mrf.mxu1  ;;  %v1851_v57 = vpop.f32.mrf.mxu0 }
 0x851   : > { %2599 = vpow2.f32 %v1613_v53  ;;  %v1770_v55 = vsel %vm3640_vm12, %v1767_v54, -1e-30  ;;  %v1854_v59 = vsel %vm3640_vm12, %v1851_v57, -1e-30 }
 0x852   : > { %v1771_v56 = vsel %vm1085_vm1, %v1770_v55, -inf  ;;  %v1855_v61 = vsel %vm1085_vm1, %v1854_v59, -inf }
 0x853   : > { %1772 = vmax.xlane.f32.xlu2 %v1771_v56 }
 0x857   : > { %v2600_v58 = vpop.eup %2599 }
 0x858   : > { %v1615_v60 = vsel %vm1085_vm1, %v2600_v58, 0.0 }
 0x859   : > { %1616 = vadd.xlane.f32.xlu0 %v1615_v60 }
 0x85b   : > { %1856 = vmax.xlane.f32.xlu2 %v1855_v61 }
 0x864   : > { %1711 = vrot.lane.b32.xlu1 %v1575_v0, %s3121_s2  ;;  %s3885_s2 = smov 24  }
 0x86d   : > { %1879 = vrot.lane.b32.xlu0 %v1575_v0, %s3125_s19 }
 0x8be   : > { %v1688_v1 = vpop.xlane.xlu1 %1687 }
 0x8bf   : > { %v1689_v2 = vsub.f32 %v1685_v49, %v1688_v1 }
 0x8c1   : > { %v1690_v3 = vmul.f32 1.442695, %v1689_v2 }
 0x8c3   : > { %2601 = vpow2.f32 %v1690_v3 }
 0x8c6   : > { %v1773_v5 = vpop.xlane.xlu2 %1772 }
 0x8c7   : > { %v1774_v6 = vsub.f32 %v1770_v55, %v1773_v5 }
 0x8c9   : > { %v2602_v8 = vpop.eup %2601  ;;  %v1775_v9 = vmul.f32 1.442695, %v1774_v6 }
 0x8ca   : > { %v1692_v10 = vsel %vm1085_vm1, %v2602_v8, 0.0 }
 0x8cb   : > { %2603 = vpow2.f32 %v1775_v9  ;;  %1693 = vadd.xlane.f32.xlu2 %v1692_v10  ;;  %v1914_v10 = vld [vmem:[#allocation11 + $0x18] sm:$0xff] }
 0x8cc   : > { %v1617_v11 = vpop.xlane.xlu0 %1616  ;;  %1934 = vmatpush.msra.mxu1 %v1914_v10 }
 0x8cd   : > { %2605 = vrcp.f32 %v1617_v11  ;;  %v1629_v19 = vand.u32 2147483648, %v1617_v11  ;;  %v1627_v21 = vand.u32 2147483647, %v1617_v11  ;;  %vm1623_vm14 = vweird.f32 %v1617_v11 }
 0x8ce   : > { %v1857_v12 = vpop.xlane.xlu2 %1856 }
 0x8cf   : > { %v1858_v13 = vsub.f32 %v1854_v59, %v1857_v12  ;;  %v1630_v26 = vor.u32 1.1754944e-38, %v1629_v19  ;;  %vm1628_vm2 = vcmp.eq.f32.partialorder %v1627_v21, 8.507059e+37  ;;  %v1912_v12 = vld [vmem:[#allocation11 + $0x8] sm:$0xff] }
 0x8d1   : > { %v3675_v14 = vpop.eup %2603  ;;  %v1859_v15 = vmul.f32 1.442695, %v1858_v13  ;;  %v1911_v13 = vld [vmem:[#allocation11] sm:$0xff] }
 0x8d2   : > { %v1777_v16 = vsel %vm1085_vm1, %v3675_v14, 0.0 }
 0x8d3   : > { %v2606_v17 = vpop.eup %2605  ;;  %2607 = vpow2.f32 %v1859_v15  ;;  %1778 = vadd.xlane.f32.xlu2 %v1777_v16 }
 0x8d4   : > { %v1619_v7 = vmul.f32 %v2606_v17, %v1617_v11  ;;  %vm1624_vm13 = vweird.f32 %v2606_v17  ;;  %v1913_v11 = vld [vmem:[#allocation11 + $0x10] sm:$0xff] }
 0x8d5   : > { %vm1625_vm15 = vmor %vm1623_vm14, %vm1624_vm13  ;;  %1935 = vmatpush.msra.mxu1 %v1913_v11 }
 0x8d6   : > { %v1620_v18 = vsub.f32 1.0, %v1619_v7  ;;  %v1712_v29 = vpop.permute.xlu1 %1711  ;;  %v2574_v7 = vld [vmem:[#allocation12] ss:$0 sm:$0xff] }
 0x8d7   : > { %1732 = vmatpush.msra.mxu2 %v1712_v29  ;;  %1936 = vmatpush.msra.mxu1 %v1912_v12 }
 0x8d8   : > { %v1621_v20 = vmul.f32 %v2606_v17, %v1620_v18 }
 0x8d9   : > { %v3679_v22 = vpop.eup %2607  ;;  %1937 = vmatpush.msra.mxu1 %v1911_v13 }
 0x8da   : > { %v1622_v24 = vadd.f32 %v2606_v17, %v1621_v20  ;;  %v1861_v25 = vsel %vm1085_vm1, %v3679_v22, 0.0 }
 0x8db   : > { %1862 = vadd.xlane.f32.xlu2 %v1861_v25  ;;  %v1980_v25 = vld [vmem:[#allocation17 + $0x18] sm:$0xff] }
 0x8dc   : > { %v1626_v4 = vsel %vm1625_vm15, %v2606_v17, %v1622_v24 }
 0x8dd   : > { %v1631_v27 = vsel %vm1628_vm2, %v1630_v26, %v1626_v4  ;;  %v1979_v26 = vld [vmem:[#allocation17 + $0x10] sm:$0xff]  ;;  %v1978_v4 = vld [vmem:[#allocation17 + $0x8] sm:$0xff] }
 0x8de   : > { %v1632_v28 = vmul.f32 %v2600_v58, %v1631_v27  ;;  %v1977_v27 = vld [vmem:[#allocation17] sm:$0xff] }
 0x8df   : > { %v1880_v30 = vpop.permute.xlu0 %1879 }
 0x8e0   : > { %2372 = vmatmul.msk.f32.vlgmr.msra.gmra.mxu3 %vm1085_vm1, %v1632_v28  ;;  %1900 = vmatpush.msrb.mxu2 %v1880_v30 }
 0x8f3   : > { %1795 = vrot.lane.b32.xlu2 %v1575_v0, %s3124_s4  ;;  %s2100_s4 = sshll.u32 %s2096_s14, 4  ;;  %s2101_s4 = int_to_ptr.hbm [resolvable:$true] %s2100_s4 }
 0x8f4   : > { %s3023_s19 = sshra.s32 %s2101_s4, 4  ;;  %s3024_s19 = int_to_ptr.hbm [resolvable:$true] %s3023_s19 }
 0x8f5   : > { %s3025_s17 = scalar_lea.hbm %s3024_s19, 8  ;;  %p3030_p9 = scmp.lt.s32.totalorder %s3024_s19, %s3887_s5 }
 0x8f6   : > { %p3026_p1 = scmp.ne.s32.totalorder %s3024_s19, %s3025_s17 }
 0x8f8   : > { %p3027_p13 = pnand %p3026_p1, %p3388_p0 }
 0x8fa   : > { %p3028_p7 = pneg %p3027_p13 }
 0x93e   : > { %v1694_v31 = vpop.xlane.xlu2 %1693 }
 0x93f   : > { %2609 = vrcp.f32 %v1694_v31  ;;  %v1706_v36 = vand.u32 2147483648, %v1694_v31  ;;  %v1704_v38 = vand.u32 2147483647, %v1694_v31  ;;  %vm1700_vm4 = vweird.f32 %v1694_v31 }
 0x941   : > { %v1707_v41 = vor.u32 1.1754944e-38, %v1706_v36  ;;  %vm1705_vm9 = vcmp.eq.f32.partialorder %v1704_v38, 8.507059e+37 }
 0x945   : > { %v2610_v32 = vpop.eup %2609 }
 0x946   : > { %v1696_v33 = vmul.f32 %v2610_v32, %v1694_v31  ;;  %v1779_v34 = vpop.xlane.xlu2 %1778  ;;  %vm1701_vm3 = vweird.f32 %v2610_v32 }
 0x947   : > { %2611 = vrcp.f32 %v1779_v34  ;;  %vm1702_vm8 = vmor %vm1700_vm4, %vm1701_vm3  ;;  %v1791_v48 = vand.u32 2147483648, %v1779_v34  ;;  %v1789_v50 = vand.u32 2147483647, %v1779_v34  ;;  %vm1785_vm11 = vweird.f32 %v1779_v34 }
 0x948   : > { %v1697_v35 = vsub.f32 1.0, %v1696_v33 }
 0x949   : > { %v1792_v53 = vor.u32 1.1754944e-38, %v1791_v48  ;;  %vm1790_vm13 = vcmp.eq.f32.partialorder %v1789_v50, 8.507059e+37 }
 0x94a   : > { %v1698_v37 = vmul.f32 %v2610_v32, %v1697_v35 }
 0x94c   : > { %v1699_v39 = vadd.f32 %v2610_v32, %v1698_v37 }
 0x94d   : > { %v2612_v40 = vpop.eup %2611 }
 0x94e   : > { %v1703_v42 = vsel %vm1702_vm8, %v2610_v32, %v1699_v39  ;;  %v1781_v43 = vmul.f32 %v2612_v40, %v1779_v34  ;;  %v1863_v44 = vpop.xlane.xlu2 %1862  ;;  %vm1786_vm10 = vweird.f32 %v2612_v40 }
 0x94f   : > { %v1708_v45 = vsel %vm1705_vm9, %v1707_v41, %v1703_v42  ;;  %2613 = vrcp.f32 %v1863_v44  ;;  %vm1787_vm12 = vmor %vm1785_vm11, %vm1786_vm10  ;;  %v1875_v60 = vand.u32 2147483648, %v1863_v44  ;;  %v1873_v62 = vand.u32 2147483647, %v1863_v44 }
 0x950   : > { %v1782_v46 = vsub.f32 1.0, %v1781_v43  ;;  %v1709_v47 = vmul.f32 %v2602_v8, %v1708_v45  ;;  %vm1869_vm15 = vweird.f32 %v1863_v44 }
 0x951   : > { %v1876_v0 = vor.u32 1.1754944e-38, %v1875_v60  ;;  %vm1874_vm3 = vcmp.eq.f32.partialorder %v1873_v62, 8.507059e+37 }
 0x952   : > { %v1783_v49 = vmul.f32 %v2612_v40, %v1782_v46  ;;  %2375 = vmatmul.msk.f32.vlgmr.msra.gmra.mxu2 %vm1085_vm1, %v1709_v47 }
 0x954   : > { %v1784_v51 = vadd.f32 %v2612_v40, %v1783_v49 }
 0x955   : > { %v2614_v52 = vpop.eup %2613 }
 0x956   : > { %v1788_v54 = vsel %vm1787_vm12, %v2612_v40, %v1784_v51  ;;  %v1865_v55 = vmul.f32 %v2614_v52, %v1863_v44  ;;  %v1796_v56 = vpop.permute.xlu2 %1795  ;;  %vm1870_vm14 = vweird.f32 %v2614_v52 }
 0x957   : > { %v1793_v57 = vsel %vm1790_vm13, %v1792_v53, %v1788_v54  ;;  %1816 = vmatpush.msrb.mxu3 %v1796_v56  ;;  %vm1871_vm2 = vmor %vm1869_vm15, %vm1870_vm14  ;;  %v2575_v54 = vld [vmem:[#allocation14] ss:$0 sm:$0xff] }
 0x958   : > { %v1866_v58 = vsub.f32 1.0, %v1865_v55  ;;  %v1794_v59 = vmul.f32 %v3675_v14, %v1793_v57  ;;  %v2576_v57 = vld [vmem:[#allocation15] ss:$0 sm:$0xff] }
 0x959   : > { %2000 = vmatpush.msra.mxu3 %v1980_v25 }
 0x95a   : > { %v1867_v61 = vmul.f32 %v2614_v52, %v1866_v58  ;;  %2378 = vmatmul.msk.f32.vlgmr.msrb.gmra.mxu3 %vm1085_vm1, %v1794_v59 }
 0x95b   : > { %2001 = vmatpush.msra.mxu3 %v1979_v26  ;;  %v2579_v26 = vld [vmem:[#allocation21] ss:$0 sm:$0xff] }
 0x95c   : > { %v1868_v63 = vadd.f32 %v2614_v52, %v1867_v61 }
 0x95d   : > { %2002 = vmatpush.msra.mxu3 %v1978_v4 }
 0x95e   : > { %v1872_v1 = vsel %vm1871_vm2, %v2614_v52, %v1868_v63  ;;  %v2577_v63 = vld [vmem:[#allocation18] ss:$0 sm:$0xff] }
 0x95f   : > { %v1877_v2 = vsel %vm1874_vm3, %v1876_v0, %v1872_v1  ;;  %2003 = vmatpush.msra.mxu3 %v1977_v27 }
 0x960   : > { %v1878_v3 = vmul.f32 %v3679_v22, %v1877_v2 }
 0x962   : > { %2381 = vmatmul.msk.f32.vlgmr.msrb.gmra.mxu2 %vm1085_vm1, %v1878_v3  ;;  %v2578_v3 = vld [vmem:[#allocation20] ss:$0 sm:$0xff] }
 0x963   : > { %v1653_v5 = vpop.f32.mrf.mxu3 }
 0x964   : > { %1656 = vst.msk [vmem:[#allocation2] sm:$0xff] %vm1085_vm1, %v1653_v5 }
 0x9d5   : > { %v1734_v6 = vpop.f32.mrf.mxu2 }
 0x9d6   : > { %1738 = vrot.lane.b32.xlu1 %v1734_v6, %s3129_s9  ;;  %s3886_s9 = sld [smem:[#allocation56_spill]] }
 0x9dc   : > { %v2023_v30 = vld [vmem:[%s3886_s9 + $0x70] sm:$0xff]  ;;  %v2022_v34 = vld [vmem:[%s3886_s9 + $0x68] sm:$0xff]  ;;  %v2021_v36 = vld [vmem:[%s3886_s9 + $0x60] sm:$0xff] }
 0x9dd   : > { %v1818_v8 = vpop.f32.mrf.mxu3  ;;  %v2020_v38 = vld [vmem:[%s3886_s9 + $0x58] sm:$0xff]  ;;  %v2019_v39 = vld [vmem:[%s3886_s9 + $0x50] sm:$0xff]  ;;  %v2018_v40 = vld [vmem:[%s3886_s9 + $0x48] sm:$0xff] }
 0x9de   : > { %1822 = vrot.lane.b32.xlu2 %v1818_v8, %s3884_s30  ;;  %v2017_v41 = vld [vmem:[%s3886_s9 + $0x40] sm:$0xff]  ;;  %v2016_v43 = vld [vmem:[%s3886_s9 + $0x38] sm:$0xff]  ;;  %v2015_v45 = vld [vmem:[%s3886_s9 + $0x30] sm:$0xff]  ;;  %s1034_s30 = scalar_lea.vmem [#allocation24], %s3442_s24  ;;  %s3029_s24 = scalar_lea.hbm %s3887_s5, 16 }
 0x9df   : > { %v2014_v47 = vld [vmem:[%s3886_s9 + $0x28] sm:$0xff]  ;;  %v2013_v49 = vld [vmem:[%s3886_s9 + $0x20] sm:$0xff]  ;;  %v2012_v51 = vld [vmem:[%s3886_s9 + $0x18] sm:$0xff]  ;;  %p3031_p8 = scmp.lt.s32.totalorder %s3029_s24, %s3025_s17 }
 0x9e0   : > { %v2011_v60 = vld [vmem:[%s3886_s9 + $0x10] sm:$0xff]  ;;  %v2010_v61 = vld [vmem:[%s3886_s9 + $0x8] sm:$0xff]  ;;  %v2009_v62 = vld [vmem:[%s3886_s9] sm:$0xff] }
 0x9e1   : > { %p3032_p10 = por %p3031_p8, %p3030_p9 }
 0x9e3   : > { %p3033_p12 = pnand %p3032_p10, %p3028_p7 }
 0x9e5   : > { %v1902_v9 = vpop.f32.mrf.mxu2 }
 0x9e6   : > { %1906 = vrot.lane.b32.xlu1 %v1902_v9, %s3885_s2  ;;  %s2098_s2 = sshll.u32 %s1034_s30, 4  ;;  %s2099_s2 = int_to_ptr.vmem [resolvable:$true] %s2098_s2 }
 0xa38   : > { %v1823_v15 = vpop.permute.xlu2 %1822 }
 0xa48   : > { %v1739_v14 = vpop.permute.xlu1 %1738 }
 0xa49   : > { %1741 = vst.msk [vmem:[#allocation2] sm:$0xff] %vm1245_vm5, %v1739_v14 }
 0xa4a   : > { %1825 = vst.msk [vmem:[#allocation2] sm:$0xff] %vm1330_vm6, %v1823_v15 }
 0xa58   : > { %v1907_v16 = vpop.permute.xlu1 %1906 }
 0xa59   : > { %1909 = vst.msk [vmem:[#allocation2] sm:$0xff] %vm1415_vm7, %v1907_v16 }
 0xa60   : > { %v1910_v17 = vld [vmem:[#allocation2] sm:$0xff] }
 0xa61   : > { %2382 = vmatmul.msk.f32.vlgmr.msra.gmra.mxu1 %vm1053_vm0, %v1910_v17 }
 0xade   : > { %v1939_v18 = vpop.f32.mrf.mxu1 }
 0xadf   : > { %v1940_v19 = vadd.f32 %v2574_v7, %v1939_v18 }
 0xae1   : > { %v1942_v20 = vadd.f32 %v1940_v19, %v3615_v23  ;;  %v2024_v23 = vld [vmem:[%s3886_s9 + $0x78] sm:$0xff] }
 0xae2   : > { %2029 = vmatpush.msrb.mxu0 %v2024_v23 }
 0xae3   : > { %v1943_v21 = vsel %vm1053_vm0, %v1942_v20, 0.0  ;;  %v1947_v22 = vmul.f32 %v1942_v20, %v1942_v20 }
 0xae4   : > { %1944 = vadd.xlane.f32.xlu0 %v1943_v21  ;;  %2030 = vmatpush.msrb.mxu0 %v2023_v30 }
 0xae5   : > { %v1948_v24 = vsel %vm1053_vm0, %v1947_v22, 0.0 }
 0xae6   : > { %1949 = vadd.xlane.f32.xlu2 %v1948_v24  ;;  %2031 = vmatpush.msrb.mxu0 %v2022_v34 }
 0xae8   : > { %2032 = vmatpush.msrb.mxu0 %v2021_v36 }
 0xaea   : > { %2033 = vmatpush.msrb.mxu0 %v2020_v38 }
 0xaec   : > { %2034 = vmatpush.msrb.mxu0 %v2019_v39 }
 0xaee   : > { %2035 = vmatpush.msrb.mxu0 %v2018_v40 }
 0xaf0   : > { %2036 = vmatpush.msrb.mxu0 %v2017_v41 }
 0xaf2   : > { %2037 = vmatpush.msrb.mxu0 %v2016_v43 }
 0xaf4   : > { %2038 = vmatpush.msrb.mxu0 %v2015_v45 }
 0xaf6   : > { %2039 = vmatpush.msrb.mxu0 %v2014_v47 }
 0xaf8   : > { %2040 = vmatpush.msrb.mxu0 %v2013_v49 }
 0xafa   : > { %2041 = vmatpush.msrb.mxu0 %v2012_v51 }
 0xafc   : > { %2042 = vmatpush.msrb.mxu0 %v2011_v60 }
 0xafe   : > { %2043 = vmatpush.msrb.mxu0 %v2010_v61 }
 0xb00   : > { %2044 = vmatpush.msrb.mxu0 %v2009_v62 }
 0xb57   : > { %v1945_v28 = vpop.xlane.xlu0 %1944 }
 0xb58   : > { %v1946_v29 = vmul.f32 0.03125, %v1945_v28  ;;  %v2580_v28 = vld [vmem:[#allocation23] ss:$0 sm:$0xff] }
 0xb59   : > { %v1950_v31 = vpop.xlane.xlu2 %1949 }
 0xb5a   : > { %v1952_v32 = vmul.f32 %v1946_v29, %v1946_v29  ;;  %v1951_v33 = vmul.f32 0.03125, %v1950_v31  ;;  %v1954_v53 = vsub.f32 %v1942_v20, %v1946_v29 }
 0xb5c   : > { %v1953_v35 = vsub.f32 %v1951_v33, %v1952_v32 }
 0xb5e   : > { %v1955_v37 = vadd.f32 1e-05, %v1953_v35 }
 0xb60   : > { %2615 = vrsqrt.f32 %v1955_v37  ;;  %vm1962_vm5 = vweird.f32 %v1955_v37 }
 0xb66   : > { %v2616_v42 = vpop.eup %2615 }
 0xb67   : > { %v1957_v44 = vmul.f32 %v2616_v42, %v1955_v37  ;;  %vm1963_vm1 = vweird.f32 %v2616_v42 }
 0xb68   : > { %vm1964_vm6 = vmor %vm1962_vm5, %vm1963_vm1 }
 0xb69   : > { %v1958_v46 = vmul.f32 %v2616_v42, %v1957_v44 }
 0xb6b   : > { %v1959_v48 = vmul.f32 0.5, %v1958_v46 }
 0xb6d   : > { %v1960_v50 = vsub.f32 1.5, %v1959_v48 }
 0xb6f   : > { %v1961_v52 = vmul.f32 %v2616_v42, %v1960_v50 }
 0xb71   : > { %v1965_v55 = vsel %vm1964_vm6, %v2616_v42, %v1961_v52 }
 0xb72   : > { %v1966_v56 = vmul.f32 %v1965_v55, %v1954_v53 }
 0xb74   : > { %v1971_v58 = vmul.f32 %v2575_v54, %v1966_v56 }
 0xb76   : > { %v1976_v59 = vadd.f32 %v2576_v57, %v1971_v58 }
 0xb78   : > { %2383 = vmatmul.msk.f32.vlgmr.msra.gmra.mxu3 %vm1053_vm0, %v1976_v59 }
 0xbfb   : > { %v2005_v0 = vpop.f32.mrf.mxu3 }
 0xbfc   : > { %v2006_v1 = vadd.f32 %v2577_v63, %v2005_v0 }
 0xbfe   : > { %v2008_v2 = vmax.f32 %v2006_v1, 0.0 }
 0xc00   : > { %2045 = vmatmul.f32.vlgmr.msrb.gmra.mxu0 %v2008_v2 }
 0xc7d   : > { %v2046_v5 = vpop.f32.mrf.mxu0 }
 0xc7e   : > { %v2047_v6 = vadd.f32 %v2578_v3, %v2046_v5 }
 0xc80   : > { %v2049_v8 = vadd.f32 %v2047_v6, %v1976_v59 }
 0xc82   : > { %v2050_v9 = vsel %vm1053_vm0, %v2049_v8, 0.0  ;;  %v2054_v10 = vmul.f32 %v2049_v8, %v2049_v8 }
 0xc83   : > { %2051 = vadd.xlane.f32.xlu1 %v2050_v9 }
 0xc84   : > { %v2055_v11 = vsel %vm1053_vm0, %v2054_v10, 0.0 }
 0xc85   : > { %2056 = vadd.xlane.f32.xlu2 %v2055_v11 }
 0xcf6   : > { %v2052_v12 = vpop.xlane.xlu1 %2051 }
 0xcf7   : > { %v2053_v13 = vmul.f32 0.03125, %v2052_v12 }
 0xcf8   : > { %v2057_v14 = vpop.xlane.xlu2 %2056 }
 0xcf9   : > { %v2059_v15 = vmul.f32 %v2053_v13, %v2053_v13  ;;  %v2058_v16 = vmul.f32 0.03125, %v2057_v14  ;;  %v2061_v25 = vsub.f32 %v2049_v8, %v2053_v13 }
 0xcfb   : > { %v2060_v17 = vsub.f32 %v2058_v16, %v2059_v15 }
 0xcfd   : > { %v2062_v7 = vadd.f32 1e-05, %v2060_v17 }
 0xcff   : > { %2617 = vrsqrt.f32 %v2062_v7  ;;  %vm2069_vm4 = vweird.f32 %v2062_v7 }
 0xd05   : > { %v2618_v18 = vpop.eup %2617 }
 0xd06   : > { %v2064_v19 = vmul.f32 %v2618_v18, %v2062_v7  ;;  %vm2070_vm7 = vweird.f32 %v2618_v18 }
 0xd07   : > { %vm2071_vm8 = vmor %vm2069_vm4, %vm2070_vm7 }
 0xd08   : > { %v2065_v20 = vmul.f32 %v2618_v18, %v2064_v19 }
 0xd0a   : > { %v2066_v21 = vmul.f32 0.5, %v2065_v20 }
 0xd0c   : > { %v2067_v22 = vsub.f32 1.5, %v2066_v21 }
 0xd0e   : > { %v2068_v24 = vmul.f32 %v2618_v18, %v2067_v22 }
 0xd10   : > { %v2072_v4 = vsel %vm2071_vm8, %v2618_v18, %v2068_v24 }
 0xd11   : > { %v2073_v27 = vmul.f32 %v2072_v4, %v2061_v25 }
 0xd13   : > { %v2078_v29 = vmul.f32 %v2579_v26, %v2073_v27 }
 0xd15   : > { %v2083_v23 = vadd.f32 %v2580_v28, %v2078_v29 }
 0xd17   : > { %2084 = vst.msk [vmem:[%s1034_s30] sm:$0xff] %vm1053_vm0, %v2083_v23 }
 0xd18   : > { %3036 = shalt.err (!%p3033_p12)
}
 0xd19   : > { %2436 = dma.vmem_to_hbm [thread:$0]  (%p3388_p0), %s2099_s2, 128, %s2101_s4, %s2086_s0  }
 0xd1a PF: > { %s2112_s23 = sand.u32 1, %s3091_s27   ;;  %p3888_p4 = scmp.ge.s32.totalorder %s3103_s28, 2 }
 0xd1b   : > { %s2113_s20 = scalar_lea.sflag [#allocation5], %s2112_s23 }
 0xd1c   : > { %p2480_p11 = pnand %p3888_p4, %p3394_p6 }
 0xd1e   : > { %p2481_p2 = pneg %p2480_p11 }
 0xd20   : > { %3086 = dma.done.wait (%p2481_p2), %s2113_s20, 128  }
 0xd21   : > { %3088 = vsyncadd (%p2481_p2), %s2113_s20, 4294967168  ;;  %s3889_s15 = sld [smem:[#allocation34_spill]]  ;;  %p47_p5 = scmp.ge.s32.totalorder %s3364_s22, 4  }
 0xd22   : > { %s3890_s7 = sld [smem:[#allocation35_spill]]  ;;  %s3891_s27 = smov %s3095_s3 }
 0xd23   : > { %s3893_s28 = smov %s3364_s22  ;;  %49 = sbr.rel (!%p47_p5) target bundleno = 38 (0x26), region = 232 }
 0xd27   : > { %s3892_s3 = smov %s3889_s15 }
 0xd28   :  { %2119 = vsyncpa [#allocation4], 1 }
 0xd29   :  { %2121 = vsyncpa [#allocation4 + $0x1], 1 }
 0xd2a   :  { %2122 = vsyncpa [#allocation7], 1 }
 0xd2b   :  { %2124 = vsyncpa [#allocation7 + $0x1], 1 }
 0xd2c   :  { %2125 = vsyncpa [#allocation10], 1 }
 0xd2d   :  { %2126 = vsyncpa [#allocation13], 1 }
 0xd2e   :  { %2127 = vsyncpa [#allocation16], 1 }
 0xd2f   :  { %2128 = vsyncpa [#allocation19], 1 }
 0xd30   :  { %2129 = vsyncpa [#allocation22], 1 }
 0xd31   :  { %2130 = vsyncpa [#allocation5], 1 }
 0xd32   :  { %2132 = vsyncpa [#allocation5 + $0x1], 1 }

</bundles_post_ra>
